<compile_context>
chip_gen: v7x
topology: tpu7x:2x2x1
jax: 0.10.0
libtpu: 0.0.40
codegen_flags: <defaults>
</compile_context>

<pallas_src>
import functools
import math
import numpy as np
import jax
import jax.numpy as jnp
from jax import lax
from jax.experimental import pallas as pl
from jax.experimental.pallas import tpu as pltpu

_SQRT_2_OVER_PI = 0.7978845608028654
_LN_EPS = 1e-5          # PyTorch LayerNorm default eps
_HID = 256              # fixed hidden width of Boundary.linear1's first layer
_EMB = 64               # SinusoidalPositionEmbeddings(64)

# vec-row indices inside the weight slab (every row is 2*ic lanes wide)
(_V_B1B, _V_BE, _V_G1, _V_N1, _V_B2,
 _V_G2, _V_N2, _V_W3, _V_B3, _V_MASK) = range(10)
_N_VEC = 10


def _gelu(v):
    # TODO(synk): nn.GELU() defaults to the exact erf form; the tanh
    # approximation is used because erf is not guaranteed to lower in Mosaic.
    return 0.5 * v * (1.0 + jnp.tanh(_SQRT_2_OVER_PI * (v + 0.044715 * v * v * v)))


def _boundary_kernel(acts_ref, w_ref, out_ref):
    n2 = w_ref.shape[1]              # 2 * in_channel
    ic = n2 // 2
    khw = acts_ref.shape[0] - 2      # pooling window size kh*kw

    # ---- static row offsets inside the weight slab ----
    r_w1b = 0                        # (256, n2)  Linear(256, ic) weight (padded cols)
    r_we = r_w1b + _HID              # (64, n2)   embed Linear(64, 2*ic) weight
    r_w2 = r_we + _EMB               # (n2, n2)   Linear(2*ic, ic) weight (padded cols)
    n_parts = _HID // n2 if n2 <= _HID else 1
    r_w1a = r_w2 + n2                # (n_parts, n2) Linear(1, 256) weight rows
    r_b1a = r_w1a + n_parts          # (n_parts, n2) Linear(1, 256) bias rows
    r_vec = r_b1a + n_parts          # (_N_VEC, n2)  bias / LayerNorm / mask rows

    def vrow(i):
        return w_ref[r_vec + i:r_vec + i + 1, :]                    # (1, n2)

    sincos = acts_ref[0][:, 0:_EMB]                                 # (bb, 64) [sin|cos]
    xb = acts_ref[1]                                                # (bb, n2) x broadcast

    # ---- feature_encode: AdaptiveAvgPool2d + Flatten ----
    # Window-major rows built in the wrapper; pooled values already live in
    # lanes [ic, 2*ic), lanes [0, ic) are zero.
    feat = acts_ref[2]
    for k in range(3, khw + 2):
        feat = feat + acts_ref[k]
    feat = feat * (1.0 / khw)                                       # (bb, n2)

    # ---- linear1: Linear(1,256)+GELU, Linear(256,ic)+GELU (ic padded to n2) ----
    if n2 <= _HID:
        pre = None
        for p in range(n_parts):
            z1p = _gelu(xb * w_ref[r_w1a + p:r_w1a + p + 1, :]
                        + w_ref[r_b1a + p:r_b1a + p + 1, :])        # (bb, n2)
            part = jnp.dot(z1p, w_ref[r_w1b + p * n2:r_w1b + (p + 1) * n2, :],
                           preferred_element_type=jnp.float32)
            pre = part if pre is None else pre + part
    else:
        z1 = _gelu(xb * w_ref[r_w1a:r_w1a + 1, :]
                   + w_ref[r_b1a:r_b1a + 1, :])[:, :_HID]           # (bb, 256)
        pre = jnp.dot(z1, w_ref[r_w1b:r_w1b + _HID, :],
                      preferred_element_type=jnp.float32)
    x_skip = _gelu(pre + vrow(_V_B1B))                              # lanes >= ic are 0

    # ---- embed(t): one (bb,64)@(64,n2) dot on the precomputed [sin|cos] ----
    e = _gelu(jnp.dot(sincos, w_ref[r_we:r_we + _EMB, :],
                      preferred_element_type=jnp.float32) + vrow(_V_BE))

    # ---- h = cat([x_skip, feature]) + embed(t);  norm1 = LayerNorm(2*ic) ----
    g = x_skip + feat + e                                           # all n2 lanes valid
    mean1 = jnp.sum(g, axis=-1, keepdims=True) * (1.0 / n2)
    d1 = g - mean1
    var1 = jnp.sum(d1 * d1, axis=-1, keepdims=True) * (1.0 / n2)
    h = d1 * lax.rsqrt(var1 + _LN_EPS) * vrow(_V_G1) + vrow(_V_N1)

    # ---- linear2: Linear(2*ic, ic) + GELU (output zero-padded to n2 lanes) ----
    l2 = _gelu(jnp.dot(h, w_ref[r_w2:r_w2 + n2, :],
                       preferred_element_type=jnp.float32) + vrow(_V_B2))

    # ---- norm2(x_skip + linear2(h)): LayerNorm over the ic valid lanes ----
    r = x_skip + l2                                                 # lanes >= ic are 0
    mean2 = jnp.sum(r, axis=-1, keepdims=True) * (1.0 / ic)
    d2 = (r - mean2) * vrow(_V_MASK)                                # mask padded lanes
    var2 = jnp.sum(d2 * d2, axis=-1, keepdims=True) * (1.0 / ic)
    y = d2 * lax.rsqrt(var2 + _LN_EPS) * vrow(_V_G2) + vrow(_V_N2)

    # ---- linear3: Linear(ic, 1) + Sigmoid (VPU multiply + lane reduce + EUP) ----
    logit = (jnp.sum(y * vrow(_V_W3), axis=-1, keepdims=True)
             + w_ref[r_vec + _V_B3:r_vec + _V_B3 + 1, 0:1])
    out_ref[...] = 1.0 / (1.0 + jnp.exp(-logit))


def pack_boundary_params(raw):
    """Pack PyTorch-layout Boundary parameters into one (R, 2*ic) weight slab."""
    ic = raw["l1_w2"].shape[0]                     # in_channel before the module doubles it
    n2 = 2 * ic
    assert ic >= _EMB, "kernel layout assumes in_channel >= 64"
    if n2 <= _HID:
        assert _HID % n2 == 0

    def padc(m):                                   # pad 2-D to n2 columns
        return jnp.pad(m, ((0, 0), (0, n2 - m.shape[1])))

    def padr(v):                                   # pad 1-D to n2 lanes
        return jnp.pad(v, (0, n2 - v.shape[0]))

    w1b = padc(raw["l1_w2"].T)                     # (256, n2)
    we = raw["emb_w"].T                            # (64, n2)
    w2 = padc(raw["l2_w"].T)                       # (n2, n2)

    if n2 <= _HID:
        n_parts = _HID // n2
        w1a = raw["l1_w1"][:, 0].reshape(n_parts, n2)
        b1a = raw["l1_b1"].reshape(n_parts, n2)
    else:
        w1a = padr(raw["l1_w1"][:, 0])[None]
        b1a = padr(raw["l1_b1"])[None]

    vec = jnp.stack([
        padr(raw["l1_b2"]),                        # _V_B1B
        raw["emb_b"],                              # _V_BE
        raw["n1_g"],                               # _V_G1
        raw["n1_b"],                               # _V_N1
        padr(raw["l2_b"]),                         # _V_B2
        padr(raw["n2_g"]),                         # _V_G2
        padr(raw["n2_b"]),                         # _V_N2
        padr(raw["l3_w"][0]),                      # _V_W3
        padr(raw["l3_b"]),                         # _V_B3 (scalar in lane 0)
        padr(jnp.ones((ic,), jnp.float32)),        # _V_MASK (1 on valid ic lanes)
    ], axis=0)

    wslab = jnp.concatenate([w1b, we, w2, w1a, b1a, vec], axis=0).astype(jnp.float32)
    pad_rows = (-wslab.shape[0]) % 8
    if pad_rows:
        wslab = jnp.pad(wslab, ((0, pad_rows), (0, 0)))
    return wslab


@functools.partial(jax.jit, static_argnames=("batch_block",))
def boundary_forward(x, feature, t, wslab, batch_block=64):
    """Boundary.forward(x, feature, t) with t provided (embed + norm1 path)."""
    # TODO(synk): the t-is-None branch (skip embed/norm1) is not wired up.
    n2 = wslab.shape[1]
    ic = n2 // 2
    B = x.shape[0]
    C, H, W = feature.shape[1:]
    S = int(np.sqrt(ic))                           # AdaptiveAvgPool2d(int(sqrt(in_channel)))
    assert C * S * S == ic and H % S == 0 and W % S == 0
    kh, kw = H // S, W // S

    # --- activation slab (layout plumbing only; fused under this jit) ---
    # row 0        : lanes [0, 64)   = [sin | cos] sinusoidal time table
    # row 1        : x broadcast across all n2 lanes
    # rows 2..kh*kw+1 : lanes [ic, n2) = one pooling-window sample per row
    half = _EMB // 2
    scale = math.log(10000.0) / (half - 1)
    freqs = jnp.exp(jnp.arange(half, dtype=jnp.float32) * -scale)
    ang = t.reshape(B, 1).astype(jnp.float32) * freqs[None, :]
    sincos = jnp.concatenate([jnp.sin(ang), jnp.cos(ang)], axis=-1)        # (B, 64)
    row_sc = jnp.concatenate(
        [sincos, jnp.zeros((B, n2 - _EMB), jnp.float32)], axis=-1)
    row_x = jnp.broadcast_to(x.reshape(B, 1).astype(jnp.float32), (B, n2))

    feat_p = feature.astype(jnp.float32).reshape(B, C, S, kh, S, kw)
    feat_p = jnp.transpose(feat_p, (3, 5, 0, 1, 2, 4)).reshape(kh * kw, B, ic)
    feat_p = jnp.pad(feat_p, ((0, 0), (0, 0), (ic, 0)))                    # → lanes [ic, n2)
    acts = jnp.concatenate([row_sc[None], row_x[None], feat_p], axis=0)    # (2+kh*kw, B, n2)

    bb = min(batch_block, B)
    assert B % bb == 0
    nrows = acts.shape[0]

    out = pl.pallas_call(
        _boundary_kernel,
        out_shape=jax.ShapeDtypeStruct((B, 1), jnp.float32),
        grid_spec=pltpu.PrefetchScalarGridSpec(
            num_scalar_prefetch=0,
            grid=(B // bb,),
            in_specs=[pl.BlockSpec((nrows, bb, n2), lambda b: (0, b, 0)),
                      pl.BlockSpec(wslab.shape, lambda b: (0, 0))],   # weights resident
            out_specs=pl.BlockSpec((bb, 1), lambda b: (b, 0))),
        compiler_params=pltpu.CompilerParams(
            dimension_semantics=("parallel",)),
    )(acts, wslab)
    return out


def _layernorm_ref(v, g, b):
    m = jnp.mean(v, axis=-1, keepdims=True)
    var = jnp.mean((v - m) ** 2, axis=-1, keepdims=True)
    return (v - m) * lax.rsqrt(var + _LN_EPS) * g + b


def boundary_reference(x, feature, t, raw):
    """Pure-JAX reference mirroring the PyTorch forward (same tanh-GELU)."""
    hp = lax.Precision.HIGHEST
    ic = raw["l1_w2"].shape[0]
    B = x.shape[0]
    C, H, W = feature.shape[1:]
    S = int(np.sqrt(ic))
    kh, kw = H // S, W // S

    z1 = _gelu(jnp.dot(x, raw["l1_w1"].T, precision=hp) + raw["l1_b1"])
    x_skip = _gelu(jnp.dot(z1, raw["l1_w2"].T, precision=hp) + raw["l1_b2"])

    pooled = feature.reshape(B, C, S, kh, S, kw).mean(axis=(3, 5)).reshape(B, C * S * S)
    h = jnp.concatenate([x_skip, pooled], axis=1)

    half = _EMB // 2
    scale = math.log(10000.0) / (half - 1)
    freqs = jnp.exp(jnp.arange(half, dtype=jnp.float32) * -scale)
    ang = t[:, None] * freqs[None, :]
    emb = jnp.concatenate([jnp.sin(ang), jnp.cos(ang)], axis=-1)
    e = _gelu(jnp.dot(emb, raw["emb_w"].T, precision=hp) + raw["emb_b"])

    h = _layernorm_ref(h + e, raw["n1_g"], raw["n1_b"])
    l2 = _gelu(jnp.dot(h, raw["l2_w"].T, precision=hp) + raw["l2_b"])
    y = _layernorm_ref(x_skip + l2, raw["n2_g"], raw["n2_b"])
    logit = jnp.dot(y, raw["l3_w"].T, precision=hp) + raw["l3_b"]
    return 1.0 / (1.0 + jnp.exp(-logit))


if __name__ == "__main__":
    key = jax.random.PRNGKey(0)
    ks = jax.random.split(key, 13)

    B = 128                  # larger M per MXU push; 2 batch blocks of 64 → grid=(2,)
    IC = 64                  # Boundary(in_channel=64): int(sqrt(64)) = 8 pooled grid
    IC2 = 2 * IC             # 128 (the module doubles in_channel internally)
    C, H, W = 1, 16, 16      # feature map; AdaptiveAvgPool2d(8) -> (B,1,8,8) -> (B,64)

    x = jax.random.uniform(ks[0], (B, 1), jnp.float32)
    feature = jax.random.uniform(ks[1], (B, C, H, W), jnp.float32)
    t = jax.random.uniform(ks[2], (B,), jnp.float32, 0.0, 20.0)

    def rnd(k, shape, scale=0.1):
        return jax.random.normal(k, shape, jnp.float32) * scale

    raw = dict(
        l1_w1=rnd(ks[3], (_HID, 1)), l1_b1=rnd(ks[4], (_HID,)),
        l1_w2=rnd(ks[5], (IC, _HID)), l1_b2=rnd(ks[6], (IC,)),
        l2_w=rnd(ks[7], (IC, IC2)), l2_b=rnd(ks[8], (IC,)),
        l3_w=rnd(ks[9], (1, IC)), l3_b=rnd(ks[10], (1,)),
        emb_w=rnd(ks[11], (IC2, _EMB)), emb_b=rnd(ks[12], (IC2,)),
        n1_g=jnp.ones((IC2,), jnp.float32), n1_b=jnp.zeros((IC2,), jnp.float32),
        n2_g=jnp.ones((IC,), jnp.float32), n2_b=jnp.zeros((IC,), jnp.float32),
    )

    wslab = pack_boundary_params(raw)
    out = boundary_forward(x, feature, t, wslab)
    jax.block_until_ready(out)

    ref = boundary_reference(x, feature, t, raw)
    if not np.allclose(np.asarray(out), np.asarray(ref), rtol=1e-2, atol=1e-2):
        raise AssertionError("Pallas kernel does not match reference")
    print("KERNEL_OK")
</pallas_src>

<mosaic_0001>
module attributes {stable_mosaic.version = 11 : i64} {
  func.func @_boundary_kernel(%arg0: i32, %arg1: memref<6x64x128xf32, #tpu.memory_space<vmem>>, %arg2: memref<464x128xf32, #tpu.memory_space<vmem>>, %arg3: memref<64x1xf32, #tpu.memory_space<vmem>>) attributes {dimension_semantics = [#tpu.dimension_semantics<parallel>], iteration_bounds = array<i64: 2>, scalar_prefetch = 0 : i64, scratch_operands = 0 : i64, tpu.core_type = #tpu.core_type<tc>, window_params = [{transform_indices = @transform_0, window_bounds = array<i64: 6, 64, 128>}, {pipeline_mode = #tpu.pipeline_mode<synchronous>, transform_indices = @transform_1, window_bounds = array<i64: 464, 128>}, {transform_indices = @transform_2, window_bounds = array<i64: 64, 1>}]} {
    %c0 = arith.constant 0 : index
    %c0_0 = arith.constant 0 : index
    %c0_1 = arith.constant 0 : index
    %0 = vector.load %arg1[%c0, %c0_0, %c0_1] : memref<6x64x128xf32, #tpu.memory_space<vmem>>, vector<1x64x128xf32>
    %1 = vector.shape_cast %0 : vector<1x64x128xf32> to vector<64x128xf32>
    %2 = vector.extract_strided_slice %1 {offsets = [0, 0], sizes = [64, 64], strides = [1, 1]} : vector<64x128xf32> to vector<64x64xf32>
    %c1 = arith.constant 1 : index
    %c0_2 = arith.constant 0 : index
    %c0_3 = arith.constant 0 : index
    %3 = vector.load %arg1[%c1, %c0_2, %c0_3] : memref<6x64x128xf32, #tpu.memory_space<vmem>>, vector<1x64x128xf32>
    %4 = vector.shape_cast %3 : vector<1x64x128xf32> to vector<64x128xf32>
    %c2 = arith.constant 2 : index
    %c0_4 = arith.constant 0 : index
    %c0_5 = arith.constant 0 : index
    %5 = vector.load %arg1[%c2, %c0_4, %c0_5] : memref<6x64x128xf32, #tpu.memory_space<vmem>>, vector<1x64x128xf32>
    %6 = vector.shape_cast %5 : vector<1x64x128xf32> to vector<64x128xf32>
    %c3 = arith.constant 3 : index
    %c0_6 = arith.constant 0 : index
    %c0_7 = arith.constant 0 : index
    %7 = vector.load %arg1[%c3, %c0_6, %c0_7] : memref<6x64x128xf32, #tpu.memory_space<vmem>>, vector<1x64x128xf32>
    %8 = vector.shape_cast %7 : vector<1x64x128xf32> to vector<64x128xf32>
    %9 = arith.addf %6, %8 : vector<64x128xf32>
    %c4 = arith.constant 4 : index
    %c0_8 = arith.constant 0 : index
    %c0_9 = arith.constant 0 : index
    %10 = vector.load %arg1[%c4, %c0_8, %c0_9] : memref<6x64x128xf32, #tpu.memory_space<vmem>>, vector<1x64x128xf32>
    %11 = vector.shape_cast %10 : vector<1x64x128xf32> to vector<64x128xf32>
    %12 = arith.addf %9, %11 : vector<64x128xf32>
    %c5 = arith.constant 5 : index
    %c0_10 = arith.constant 0 : index
    %c0_11 = arith.constant 0 : index
    %13 = vector.load %arg1[%c5, %c0_10, %c0_11] : memref<6x64x128xf32, #tpu.memory_space<vmem>>, vector<1x64x128xf32>
    %14 = vector.shape_cast %13 : vector<1x64x128xf32> to vector<64x128xf32>
    %15 = arith.addf %12, %14 : vector<64x128xf32>
    %cst = arith.constant 2.500000e-01 : f32
    %16 = vector.broadcast %cst : f32 to vector<64x128xf32>
    %17 = arith.mulf %15, %16 : vector<64x128xf32>
    %c448 = arith.constant 448 : index
    %c0_12 = arith.constant 0 : index
    %18 = vector.load %arg2[%c448, %c0_12] : memref<464x128xf32, #tpu.memory_space<vmem>>, vector<1x128xf32>
    %19 = vector.broadcast %18 : vector<1x128xf32> to vector<64x128xf32>
    %20 = arith.mulf %4, %19 : vector<64x128xf32>
    %c450 = arith.constant 450 : index
    %c0_13 = arith.constant 0 : index
    %21 = vector.load %arg2[%c450, %c0_13] : memref<464x128xf32, #tpu.memory_space<vmem>>, vector<1x128xf32>
    %22 = vector.broadcast %21 : vector<1x128xf32> to vector<64x128xf32>
    %23 = arith.addf %20, %22 : vector<64x128xf32>
    %cst_14 = arith.constant 5.000000e-01 : f32
    %24 = vector.broadcast %cst_14 : f32 to vector<64x128xf32>
    %25 = arith.mulf %24, %23 : vector<64x128xf32>
    %cst_15 = arith.constant 4.471500e-02 : f32
    %26 = vector.broadcast %cst_15 : f32 to vector<64x128xf32>
    %27 = arith.mulf %26, %23 : vector<64x128xf32>
    %28 = arith.mulf %27, %23 : vector<64x128xf32>
    %29 = arith.mulf %28, %23 : vector<64x128xf32>
    %30 = arith.addf %23, %29 : vector<64x128xf32>
    %cst_16 = arith.constant 0.797884583 : f32
    %31 = vector.broadcast %cst_16 : f32 to vector<64x128xf32>
    %32 = arith.mulf %31, %30 : vector<64x128xf32>
    %33 = math.tanh %32 : vector<64x128xf32>
    %cst_17 = arith.constant 1.000000e+00 : f32
    %34 = vector.broadcast %cst_17 : f32 to vector<64x128xf32>
    %35 = arith.addf %34, %33 : vector<64x128xf32>
    %36 = arith.mulf %25, %35 : vector<64x128xf32>
    %c0_18 = arith.constant 0 : index
    %c0_19 = arith.constant 0 : index
    %37 = vector.load %arg2[%c0_18, %c0_19] : memref<464x128xf32, #tpu.memory_space<vmem>>, vector<128x128xf32>
    %cst_20 = arith.constant dense<0.000000e+00> : vector<64x128xf32>
    %38 = tpu.matmul %36, %37, %cst_20 {dimension_numbers = #tpu.dot_dimension_numbers<[1], [0], [0], [1], [0, 0, 1, 1], [], []>} : vector<64x128xf32>, vector<128x128xf32>, vector<64x128xf32> -> vector<64x128xf32>
    %c449 = arith.constant 449 : index
    %c0_21 = arith.constant 0 : index
    %39 = vector.load %arg2[%c449, %c0_21] : memref<464x128xf32, #tpu.memory_space<vmem>>, vector<1x128xf32>
    %40 = vector.broadcast %39 : vector<1x128xf32> to vector<64x128xf32>
    %41 = arith.mulf %4, %40 : vector<64x128xf32>
    %c451 = arith.constant 451 : index
    %c0_22 = arith.constant 0 : index
    %42 = vector.load %arg2[%c451, %c0_22] : memref<464x128xf32, #tpu.memory_space<vmem>>, vector<1x128xf32>
    %43 = vector.broadcast %42 : vector<1x128xf32> to vector<64x128xf32>
    %44 = arith.addf %41, %43 : vector<64x128xf32>
    %cst_23 = arith.constant 5.000000e-01 : f32
    %45 = vector.broadcast %cst_23 : f32 to vector<64x128xf32>
    %46 = arith.mulf %45, %44 : vector<64x128xf32>
    %cst_24 = arith.constant 4.471500e-02 : f32
    %47 = vector.broadcast %cst_24 : f32 to vector<64x128xf32>
    %48 = arith.mulf %47, %44 : vector<64x128xf32>
    %49 = arith.mulf %48, %44 : vector<64x128xf32>
    %50 = arith.mulf %49, %44 : vector<64x128xf32>
    %51 = arith.addf %44, %50 : vector<64x128xf32>
    %cst_25 = arith.constant 0.797884583 : f32
    %52 = vector.broadcast %cst_25 : f32 to vector<64x128xf32>
    %53 = arith.mulf %52, %51 : vector<64x128xf32>
    %54 = math.tanh %53 : vector<64x128xf32>
    %cst_26 = arith.constant 1.000000e+00 : f32
    %55 = vector.broadcast %cst_26 : f32 to vector<64x128xf32>
    %56 = arith.addf %55, %54 : vector<64x128xf32>
    %57 = arith.mulf %46, %56 : vector<64x128xf32>
    %c128 = arith.constant 128 : index
    %c0_27 = arith.constant 0 : index
    %58 = vector.load %arg2[%c128, %c0_27] : memref<464x128xf32, #tpu.memory_space<vmem>>, vector<128x128xf32>
    %cst_28 = arith.constant dense<0.000000e+00> : vector<64x128xf32>
    %59 = tpu.matmul %57, %58, %cst_28 {dimension_numbers = #tpu.dot_dimension_numbers<[1], [0], [0], [1], [0, 0, 1, 1], [], []>} : vector<64x128xf32>, vector<128x128xf32>, vector<64x128xf32> -> vector<64x128xf32>
    %60 = arith.addf %38, %59 : vector<64x128xf32>
    %c452 = arith.constant 452 : index
    %c0_29 = arith.constant 0 : index
    %61 = vector.load %arg2[%c452, %c0_29] : memref<464x128xf32, #tpu.memory_space<vmem>>, vector<1x128xf32>
    %62 = vector.broadcast %61 : vector<1x128xf32> to vector<64x128xf32>
    %63 = arith.addf %60, %62 : vector<64x128xf32>
    %cst_30 = arith.constant 5.000000e-01 : f32
    %64 = vector.broadcast %cst_30 : f32 to vector<64x128xf32>
    %65 = arith.mulf %64, %63 : vector<64x128xf32>
    %cst_31 = arith.constant 4.471500e-02 : f32
    %66 = vector.broadcast %cst_31 : f32 to vector<64x128xf32>
    %67 = arith.mulf %66, %63 : vector<64x128xf32>
    %68 = arith.mulf %67, %63 : vector<64x128xf32>
    %69 = arith.mulf %68, %63 : vector<64x128xf32>
    %70 = arith.addf %63, %69 : vector<64x128xf32>
    %cst_32 = arith.constant 0.797884583 : f32
    %71 = vector.broadcast %cst_32 : f32 to vector<64x128xf32>
    %72 = arith.mulf %71, %70 : vector<64x128xf32>
    %73 = math.tanh %72 : vector<64x128xf32>
    %cst_33 = arith.constant 1.000000e+00 : f32
    %74 = vector.broadcast %cst_33 : f32 to vector<64x128xf32>
    %75 = arith.addf %74, %73 : vector<64x128xf32>
    %76 = arith.mulf %65, %75 : vector<64x128xf32>
    %c256 = arith.constant 256 : index
    %c0_34 = arith.constant 0 : index
    %77 = vector.load %arg2[%c256, %c0_34] : memref<464x128xf32, #tpu.memory_space<vmem>>, vector<64x128xf32>
    %cst_35 = arith.constant dense<0.000000e+00> : vector<64x128xf32>
    %78 = tpu.matmul %2, %77, %cst_35 {dimension_numbers = #tpu.dot_dimension_numbers<[1], [0], [0], [1], [0, 0, 1, 1], [], []>} : vector<64x64xf32>, vector<64x128xf32>, vector<64x128xf32> -> vector<64x128xf32>
    %c453 = arith.constant 453 : index
    %c0_36 = arith.constant 0 : index
    %79 = vector.load %arg2[%c453, %c0_36] : memref<464x128xf32, #tpu.memory_space<vmem>>, vector<1x128xf32>
    %80 = vector.broadcast %79 : vector<1x128xf32> to vector<64x128xf32>
    %81 = arith.addf %78, %80 : vector<64x128xf32>
    %cst_37 = arith.constant 5.000000e-01 : f32
    %82 = vector.broadcast %cst_37 : f32 to vector<64x128xf32>
    %83 = arith.mulf %82, %81 : vector<64x128xf32>
    %cst_38 = arith.constant 4.471500e-02 : f32
    %84 = vector.broadcast %cst_38 : f32 to vector<64x128xf32>
    %85 = arith.mulf %84, %81 : vector<64x128xf32>
    %86 = arith.mulf %85, %81 : vector<64x128xf32>
    %87 = arith.mulf %86, %81 : vector<64x128xf32>
    %88 = arith.addf %81, %87 : vector<64x128xf32>
    %cst_39 = arith.constant 0.797884583 : f32
    %89 = vector.broadcast %cst_39 : f32 to vector<64x128xf32>
    %90 = arith.mulf %89, %88 : vector<64x128xf32>
    %91 = math.tanh %90 : vector<64x128xf32>
    %cst_40 = arith.constant 1.000000e+00 : f32
    %92 = vector.broadcast %cst_40 : f32 to vector<64x128xf32>
    %93 = arith.addf %92, %91 : vector<64x128xf32>
    %94 = arith.mulf %83, %93 : vector<64x128xf32>
    %95 = arith.addf %76, %17 : vector<64x128xf32>
    %96 = arith.addf %95, %94 : vector<64x128xf32>
    %cst_41 = arith.constant dense<0.000000e+00> : vector<64xf32>
    %97 = vector.multi_reduction <add>, %96, %cst_41 [1] : vector<64x128xf32> to vector<64xf32>
    %98 = vector.shape_cast %97 : vector<64xf32> to vector<64x1xf32>
    %cst_42 = arith.constant 7.812500e-03 : f32
    %99 = vector.broadcast %cst_42 : f32 to vector<64x1xf32>
    %100 = arith.mulf %98, %99 : vector<64x1xf32>
    %101 = vector.broadcast %100 : vector<64x1xf32> to vector<64x128xf32>
    %102 = arith.subf %96, %101 : vector<64x128xf32>
    %103 = arith.mulf %102, %102 : vector<64x128xf32>
    %cst_43 = arith.constant dense<0.000000e+00> : vector<64xf32>
    %104 = vector.multi_reduction <add>, %103, %cst_43 [1] : vector<64x128xf32> to vector<64xf32>
    %105 = vector.shape_cast %104 : vector<64xf32> to vector<64x1xf32>
    %cst_44 = arith.constant 7.812500e-03 : f32
    %106 = vector.broadcast %cst_44 : f32 to vector<64x1xf32>
    %107 = arith.mulf %105, %106 : vector<64x1xf32>
    %cst_45 = arith.constant 9.99999974E-6 : f32
    %108 = vector.broadcast %cst_45 : f32 to vector<64x1xf32>
    %109 = arith.addf %107, %108 : vector<64x1xf32>
    %110 = math.rsqrt %109 : vector<64x1xf32>
    %111 = vector.broadcast %110 : vector<64x1xf32> to vector<64x128xf32>
    %112 = arith.mulf %102, %111 : vector<64x128xf32>
    %c454 = arith.constant 454 : index
    %c0_46 = arith.constant 0 : index
    %113 = vector.load %arg2[%c454, %c0_46] : memref<464x128xf32, #tpu.memory_space<vmem>>, vector<1x128xf32>
    %114 = vector.broadcast %113 : vector<1x128xf32> to vector<64x128xf32>
    %115 = arith.mulf %112, %114 : vector<64x128xf32>
    %c455 = arith.constant 455 : index
    %c0_47 = arith.constant 0 : index
    %116 = vector.load %arg2[%c455, %c0_47] : memref<464x128xf32, #tpu.memory_space<vmem>>, vector<1x128xf32>
    %117 = vector.broadcast %116 : vector<1x128xf32> to vector<64x128xf32>
    %118 = arith.addf %115, %117 : vector<64x128xf32>
    %c320 = arith.constant 320 : index
    %c0_48 = arith.constant 0 : index
    %119 = vector.load %arg2[%c320, %c0_48] : memref<464x128xf32, #tpu.memory_space<vmem>>, vector<128x128xf32>
    %cst_49 = arith.constant dense<0.000000e+00> : vector<64x128xf32>
    %120 = tpu.matmul %118, %119, %cst_49 {dimension_numbers = #tpu.dot_dimension_numbers<[1], [0], [0], [1], [0, 0, 1, 1], [], []>} : vector<64x128xf32>, vector<128x128xf32>, vector<64x128xf32> -> vector<64x128xf32>
    %c456 = arith.constant 456 : index
    %c0_50 = arith.constant 0 : index
    %121 = vector.load %arg2[%c456, %c0_50] : memref<464x128xf32, #tpu.memory_space<vmem>>, vector<1x128xf32>
    %122 = vector.broadcast %121 : vector<1x128xf32> to vector<64x128xf32>
    %123 = arith.addf %120, %122 : vector<64x128xf32>
    %cst_51 = arith.constant 5.000000e-01 : f32
    %124 = vector.broadcast %cst_51 : f32 to vector<64x128xf32>
    %125 = arith.mulf %124, %123 : vector<64x128xf32>
    %cst_52 = arith.constant 4.471500e-02 : f32
    %126 = vector.broadcast %cst_52 : f32 to vector<64x128xf32>
    %127 = arith.mulf %126, %123 : vector<64x128xf32>
    %128 = arith.mulf %127, %123 : vector<64x128xf32>
    %129 = arith.mulf %128, %123 : vector<64x128xf32>
    %130 = arith.addf %123, %129 : vector<64x128xf32>
    %cst_53 = arith.constant 0.797884583 : f32
    %131 = vector.broadcast %cst_53 : f32 to vector<64x128xf32>
    %132 = arith.mulf %131, %130 : vector<64x128xf32>
    %133 = math.tanh %132 : vector<64x128xf32>
    %cst_54 = arith.constant 1.000000e+00 : f32
    %134 = vector.broadcast %cst_54 : f32 to vector<64x128xf32>
    %135 = arith.addf %134, %133 : vector<64x128xf32>
    %136 = arith.mulf %125, %135 : vector<64x128xf32>
    %137 = arith.addf %76, %136 : vector<64x128xf32>
    %cst_55 = arith.constant dense<0.000000e+00> : vector<64xf32>
    %138 = vector.multi_reduction <add>, %137, %cst_55 [1] : vector<64x128xf32> to vector<64xf32>
    %139 = vector.shape_cast %138 : vector<64xf32> to vector<64x1xf32>
    %cst_56 = arith.constant 1.562500e-02 : f32
    %140 = vector.broadcast %cst_56 : f32 to vector<64x1xf32>
    %141 = arith.mulf %139, %140 : vector<64x1xf32>
    %142 = vector.broadcast %141 : vector<64x1xf32> to vector<64x128xf32>
    %143 = arith.subf %137, %142 : vector<64x128xf32>
    %c461 = arith.constant 461 : index
    %c0_57 = arith.constant 0 : index
    %144 = vector.load %arg2[%c461, %c0_57] : memref<464x128xf32, #tpu.memory_space<vmem>>, vector<1x128xf32>
    %145 = vector.broadcast %144 : vector<1x128xf32> to vector<64x128xf32>
    %146 = arith.mulf %143, %145 : vector<64x128xf32>
    %147 = arith.mulf %146, %146 : vector<64x128xf32>
    %cst_58 = arith.constant dense<0.000000e+00> : vector<64xf32>
    %148 = vector.multi_reduction <add>, %147, %cst_58 [1] : vector<64x128xf32> to vector<64xf32>
    %149 = vector.shape_cast %148 : vector<64xf32> to vector<64x1xf32>
    %cst_59 = arith.constant 1.562500e-02 : f32
    %150 = vector.broadcast %cst_59 : f32 to vector<64x1xf32>
    %151 = arith.mulf %149, %150 : vector<64x1xf32>
    %cst_60 = arith.constant 9.99999974E-6 : f32
    %152 = vector.broadcast %cst_60 : f32 to vector<64x1xf32>
    %153 = arith.addf %151, %152 : vector<64x1xf32>
    %154 = math.rsqrt %153 : vector<64x1xf32>
    %155 = vector.broadcast %154 : vector<64x1xf32> to vector<64x128xf32>
    %156 = arith.mulf %146, %155 : vector<64x128xf32>
    %c457 = arith.constant 457 : index
    %c0_61 = arith.constant 0 : index
    %157 = vector.load %arg2[%c457, %c0_61] : memref<464x128xf32, #tpu.memory_space<vmem>>, vector<1x128xf32>
    %158 = vector.broadcast %157 : vector<1x128xf32> to vector<64x128xf32>
    %159 = arith.mulf %156, %158 : vector<64x128xf32>
    %c458 = arith.constant 458 : index
    %c0_62 = arith.constant 0 : index
    %160 = vector.load %arg2[%c458, %c0_62] : memref<464x128xf32, #tpu.memory_space<vmem>>, vector<1x128xf32>
    %161 = vector.broadcast %160 : vector<1x128xf32> to vector<64x128xf32>
    %162 = arith.addf %159, %161 : vector<64x128xf32>
    %c459 = arith.constant 459 : index
    %c0_63 = arith.constant 0 : index
    %163 = vector.load %arg2[%c459, %c0_63] : memref<464x128xf32, #tpu.memory_space<vmem>>, vector<1x128xf32>
    %164 = vector.broadcast %163 : vector<1x128xf32> to vector<64x128xf32>
    %165 = arith.mulf %162, %164 : vector<64x128xf32>
    %cst_64 = arith.constant dense<0.000000e+00> : vector<64xf32>
    %166 = vector.multi_reduction <add>, %165, %cst_64 [1] : vector<64x128xf32> to vector<64xf32>
    %167 = vector.shape_cast %166 : vector<64xf32> to vector<64x1xf32>
    %c460 = arith.constant 460 : index
    %c0_65 = arith.constant 0 : index
    %168 = vector.load %arg2[%c460, %c0_65] : memref<464x128xf32, #tpu.memory_space<vmem>>, vector<1x1xf32>
    %169 = vector.broadcast %168 : vector<1x1xf32> to vector<64x1xf32>
    %170 = arith.addf %167, %169 : vector<64x1xf32>
    %cst_66 = arith.constant 0.000000e+00 : f32
    %171 = vector.broadcast %cst_66 : f32 to vector<64x1xf32>
    %172 = arith.subf %171, %170 : vector<64x1xf32>
    %173 = math.exp %172 : vector<64x1xf32>
    %cst_67 = arith.constant 1.000000e+00 : f32
    %174 = vector.broadcast %cst_67 : f32 to vector<64x1xf32>
    %175 = arith.addf %174, %173 : vector<64x1xf32>
    %cst_68 = arith.constant 1.000000e+00 : f32
    %176 = vector.broadcast %cst_68 : f32 to vector<64x1xf32>
    %177 = arith.divf %176, %175 : vector<64x1xf32>
    %c0_69 = arith.constant 0 : index
    %c0_70 = arith.constant 0 : index
    %178 = vector.load %arg3[%c0_69, %c0_70] : memref<64x1xf32, #tpu.memory_space<vmem>>, vector<64x1xf32>
    tpu.vector_store %arg3[%c0_69, %c0_70], %177 {strides = array<i32>} : memref<64x1xf32, #tpu.memory_space<vmem>>, vector<64x1xf32>,
    return
  }
  func.func @transform_0(%arg0: i32) -> (i32, i32, i32) {
    %c0_i32 = arith.constant 0 : i32
    %c0_i32_0 = arith.constant 0 : i32
    %c0_i32_1 = arith.constant 0 : i32
    return %c0_i32, %arg0, %c0_i32_0 : i32, i32, i32
  }
  func.func @transform_1(%arg0: i32) -> (i32, i32) {
    %c0_i32 = arith.constant 0 : i32
    %c0_i32_0 = arith.constant 0 : i32
    %c0_i32_1 = arith.constant 0 : i32
    return %c0_i32, %c0_i32_0 : i32, i32
  }
  func.func @transform_2(%arg0: i32) -> (i32, i32) {
    %c0_i32 = arith.constant 0 : i32
    %c0_i32_0 = arith.constant 0 : i32
    return %arg0, %c0_i32 : i32, i32
  }
}

</mosaic_0001>

<bundles_post_ra>
// kernel: boundary_forward.1
= control target key start
LH: loop header
LB: loop body
LE: loop exit
PB: predicated region body
PF: predicated region fallthrough
CT: control target
= control target key end

     0   :  { %s2467_s9 = smov 0   ;;  %s2469_s10 = smov 0   ;;  %s3405_s0 = inlined_call_operand.vmem [shape: f32[6,128,128], index: 0, kind: input, shape index: {}]   ;;  %s3406_s1 = inlined_call_operand.vmem [shape: f32[464,128], index: 1, kind: input, shape index: {}]   ;;  %s3407_s2 = inlined_call_operand.vmem [shape: f32[128,1], index: 2, kind: output, shape index: {}]  }
   0x1   :  { %s2471_s11 = smov 0  }
   0x2 LB: > { %s1816_s12 = sadd.s32 4294967295, %s2450_s11   ;;  %s2484_s13 = sadd.s32 1, %s2450_s11   ;;  %s2450_s11 = sphi %s2471_s11, %s3410_s11   ;;  %s2446_s10 = sphi %s2469_s10, %s3409_s10   ;;  %s2442_s9 = sphi %s2467_s9, %s3408_s9  }
   0x3   : > { %s16_s14 = ssub.s32 %s2450_s11, %s2484_s13  ;;  %s19_s15 = sadd.s32 1, %s2446_s10 }
   0x4   : > { %p17_p0 = scmp.eq.s32.totalorder %s16_s14, 0  ;;  %p26_p1 = scmp.ne.s32.totalorder %s2446_s10, %s2442_s9 }
   0x5   : > { %p27_p2 = scmp.eq.s32.totalorder %s2450_s11, 0  ;;  %p1819_p4 = scmp.ge.s32.totalorder %s2450_s11, 2 }
   0x6   : > { %s2493_s16 = scalar_select %p17_p0, %s2446_s10, %s19_s15  }
   0x7   : > { %p28_p3 = por %p27_p2, %p26_p1  ;;  %102 = sbr.rel (%p1819_p4) target bundleno = 43 (0x2b), region = 20 }
   0xe   : > { %105 = sbr.rel (!%p28_p3) target bundleno = 43 (0x2b), region = 24  ;;  %s107_s17 = sand.u32 (%p28_p3), 1, %s2446_s10  }
   0xf   : > { %s1889_s18 = sshll.u32 (%p28_p3), %s2450_s11, 6  ;;  %s2258_s19 = smul.u32 (%p28_p3), 384, %s107_s17 }
  0x10   : > { %s2501_s22 = scalar_lea.vmem (%p28_p3), %s3405_s0, %s1889_s18 }
  0x11   : > { %v234_v0 = vld [vmem:[%s2501_s22] sm:$0xff] (%p28_p3)  ;;  %v236_v1 = vld [vmem:[%s2501_s22 + $0x8] sm:$0xff] (%p28_p3)  ;;  %v238_v2 = vld [vmem:[%s2501_s22 + $0x10] sm:$0xff] (%p28_p3)  ;;  %s2509_s23 = scalar_lea.vmem (%p28_p3), [#allocation2], %s2258_s19 }
  0x12   : > { %v240_v3 = vld [vmem:[%s2501_s22 + $0x18] sm:$0xff] (%p28_p3)  ;;  %v242_v4 = vld [vmem:[%s2501_s22 + $0x20] sm:$0xff] (%p28_p3)  ;;  %v244_v5 = vld [vmem:[%s2501_s22 + $0x28] sm:$0xff] (%p28_p3)  ;;  %235 = vst [vmem:[%s2509_s23] sm:$0xff] (%p28_p3), %v234_v0 }
  0x13   : > { %237 = vst [vmem:[%s2509_s23 + $0x8] sm:$0xff] (%p28_p3), %v236_v1  ;;  %239 = vst [vmem:[%s2509_s23 + $0x10] sm:$0xff] (%p28_p3), %v238_v2  ;;  %v246_v6 = vld [vmem:[%s2501_s22 + $0x30] sm:$0xff] (%p28_p3)  ;;  %v248_v7 = vld [vmem:[%s2501_s22 + $0x38] sm:$0xff] (%p28_p3) }
  0x14   : > { %241 = vst [vmem:[%s2509_s23 + $0x18] sm:$0xff] (%p28_p3), %v240_v3  ;;  %243 = vst [vmem:[%s2509_s23 + $0x20] sm:$0xff] (%p28_p3), %v242_v4  ;;  %v250_v8 = vld [vmem:[%s2501_s22 + $0x80] sm:$0xff] (%p28_p3)  ;;  %v252_v9 = vld [vmem:[%s2501_s22 + $0x88] sm:$0xff] (%p28_p3) }
  0x15   : > { %245 = vst [vmem:[%s2509_s23 + $0x28] sm:$0xff] %v244_v5  ;;  %247 = vst [vmem:[%s2509_s23 + $0x30] sm:$0xff] %v246_v6  ;;  %v254_v10 = vld [vmem:[%s2501_s22 + $0x90] sm:$0xff]  ;;  %v256_v11 = vld [vmem:[%s2501_s22 + $0x98] sm:$0xff] }
  0x16   : > { %249 = vst [vmem:[%s2509_s23 + $0x38] sm:$0xff] %v248_v7  ;;  %251 = vst [vmem:[%s2509_s23 + $0x40] sm:$0xff] %v250_v8  ;;  %v258_v12 = vld [vmem:[%s2501_s22 + $0xa0] sm:$0xff]  ;;  %v260_v13 = vld [vmem:[%s2501_s22 + $0xa8] sm:$0xff] }
  0x17   : > { %253 = vst [vmem:[%s2509_s23 + $0x48] sm:$0xff] %v252_v9  ;;  %255 = vst [vmem:[%s2509_s23 + $0x50] sm:$0xff] %v254_v10  ;;  %v262_v14 = vld [vmem:[%s2501_s22 + $0xb0] sm:$0xff]  ;;  %v264_v15 = vld [vmem:[%s2501_s22 + $0xb8] sm:$0xff] }
  0x18   : > { %257 = vst [vmem:[%s2509_s23 + $0x58] sm:$0xff] %v256_v11  ;;  %259 = vst [vmem:[%s2509_s23 + $0x60] sm:$0xff] %v258_v12  ;;  %v266_v16 = vld [vmem:[%s2501_s22 + $0x100] sm:$0xff]  ;;  %v268_v17 = vld [vmem:[%s2501_s22 + $0x108] sm:$0xff] }
  0x19   : > { %261 = vst [vmem:[%s2509_s23 + $0x68] sm:$0xff] %v260_v13  ;;  %263 = vst [vmem:[%s2509_s23 + $0x70] sm:$0xff] %v262_v14  ;;  %v270_v18 = vld [vmem:[%s2501_s22 + $0x110] sm:$0xff]  ;;  %v272_v19 = vld [vmem:[%s2501_s22 + $0x118] sm:$0xff] }
  0x1a   : > { %265 = vst [vmem:[%s2509_s23 + $0x78] sm:$0xff] %v264_v15  ;;  %267 = vst [vmem:[%s2509_s23 + $0x80] sm:$0xff] %v266_v16  ;;  %v274_v20 = vld [vmem:[%s2501_s22 + $0x120] sm:$0xff]  ;;  %v276_v21 = vld [vmem:[%s2501_s22 + $0x128] sm:$0xff] }
  0x1b   : > { %269 = vst [vmem:[%s2509_s23 + $0x88] sm:$0xff] %v268_v17  ;;  %271 = vst [vmem:[%s2509_s23 + $0x90] sm:$0xff] %v270_v18  ;;  %v278_v22 = vld [vmem:[%s2501_s22 + $0x130] sm:$0xff]  ;;  %v280_v23 = vld [vmem:[%s2501_s22 + $0x138] sm:$0xff] }
  0x1c   : > { %273 = vst [vmem:[%s2509_s23 + $0x98] sm:$0xff] %v272_v19  ;;  %275 = vst [vmem:[%s2509_s23 + $0xa0] sm:$0xff] %v274_v20  ;;  %v282_v24 = vld [vmem:[%s2501_s22 + $0x180] sm:$0xff]  ;;  %v284_v25 = vld [vmem:[%s2501_s22 + $0x188] sm:$0xff] }
  0x1d   : > { %277 = vst [vmem:[%s2509_s23 + $0xa8] sm:$0xff] %v276_v21  ;;  %279 = vst [vmem:[%s2509_s23 + $0xb0] sm:$0xff] %v278_v22  ;;  %v286_v26 = vld [vmem:[%s2501_s22 + $0x190] sm:$0xff]  ;;  %v288_v27 = vld [vmem:[%s2501_s22 + $0x198] sm:$0xff] }
  0x1e   : > { %281 = vst [vmem:[%s2509_s23 + $0xb8] sm:$0xff] %v280_v23  ;;  %283 = vst [vmem:[%s2509_s23 + $0xc0] sm:$0xff] %v282_v24  ;;  %v290_v28 = vld [vmem:[%s2501_s22 + $0x1a0] sm:$0xff]  ;;  %v292_v29 = vld [vmem:[%s2501_s22 + $0x1a8] sm:$0xff] }
  0x1f   : > { %285 = vst [vmem:[%s2509_s23 + $0xc8] sm:$0xff] %v284_v25  ;;  %287 = vst [vmem:[%s2509_s23 + $0xd0] sm:$0xff] %v286_v26  ;;  %v294_v30 = vld [vmem:[%s2501_s22 + $0x1b0] sm:$0xff]  ;;  %v296_v31 = vld [vmem:[%s2501_s22 + $0x1b8] sm:$0xff] }
  0x20   : > { %289 = vst [vmem:[%s2509_s23 + $0xd8] sm:$0xff] %v288_v27  ;;  %291 = vst [vmem:[%s2509_s23 + $0xe0] sm:$0xff] %v290_v28  ;;  %v298_v32 = vld [vmem:[%s2501_s22 + $0x200] sm:$0xff]  ;;  %v300_v33 = vld [vmem:[%s2501_s22 + $0x208] sm:$0xff] }
  0x21   : > { %293 = vst [vmem:[%s2509_s23 + $0xe8] sm:$0xff] %v292_v29  ;;  %295 = vst [vmem:[%s2509_s23 + $0xf0] sm:$0xff] %v294_v30  ;;  %v302_v34 = vld [vmem:[%s2501_s22 + $0x210] sm:$0xff]  ;;  %v304_v35 = vld [vmem:[%s2501_s22 + $0x218] sm:$0xff] }
  0x22   : > { %297 = vst [vmem:[%s2509_s23 + $0xf8] sm:$0xff] %v296_v31  ;;  %299 = vst [vmem:[%s2509_s23 + $0x100] sm:$0xff] %v298_v32  ;;  %v306_v36 = vld [vmem:[%s2501_s22 + $0x220] sm:$0xff]  ;;  %v308_v37 = vld [vmem:[%s2501_s22 + $0x228] sm:$0xff] }
  0x23   : > { %301 = vst [vmem:[%s2509_s23 + $0x108] sm:$0xff] %v300_v33  ;;  %303 = vst [vmem:[%s2509_s23 + $0x110] sm:$0xff] %v302_v34  ;;  %v310_v38 = vld [vmem:[%s2501_s22 + $0x230] sm:$0xff]  ;;  %v312_v39 = vld [vmem:[%s2501_s22 + $0x238] sm:$0xff] }
  0x24   : > { %305 = vst [vmem:[%s2509_s23 + $0x118] sm:$0xff] %v304_v35  ;;  %307 = vst [vmem:[%s2509_s23 + $0x120] sm:$0xff] %v306_v36  ;;  %v314_v40 = vld [vmem:[%s2501_s22 + $0x280] sm:$0xff]  ;;  %v316_v41 = vld [vmem:[%s2501_s22 + $0x288] sm:$0xff] }
  0x25   : > { %309 = vst [vmem:[%s2509_s23 + $0x128] sm:$0xff] %v308_v37  ;;  %311 = vst [vmem:[%s2509_s23 + $0x130] sm:$0xff] %v310_v38  ;;  %v318_v42 = vld [vmem:[%s2501_s22 + $0x290] sm:$0xff]  ;;  %v320_v43 = vld [vmem:[%s2501_s22 + $0x298] sm:$0xff] }
  0x26   : > { %313 = vst [vmem:[%s2509_s23 + $0x138] sm:$0xff] %v312_v39  ;;  %315 = vst [vmem:[%s2509_s23 + $0x140] sm:$0xff] %v314_v40  ;;  %v322_v44 = vld [vmem:[%s2501_s22 + $0x2a0] sm:$0xff]  ;;  %v324_v45 = vld [vmem:[%s2501_s22 + $0x2a8] sm:$0xff] }
  0x27   : > { %317 = vst [vmem:[%s2509_s23 + $0x148] sm:$0xff] %v316_v41  ;;  %319 = vst [vmem:[%s2509_s23 + $0x150] sm:$0xff] %v318_v42  ;;  %v326_v46 = vld [vmem:[%s2501_s22 + $0x2b0] sm:$0xff]  ;;  %v328_v47 = vld [vmem:[%s2501_s22 + $0x2b8] sm:$0xff] }
  0x28   : > { %321 = vst [vmem:[%s2509_s23 + $0x158] sm:$0xff] %v320_v43  ;;  %323 = vst [vmem:[%s2509_s23 + $0x160] sm:$0xff] %v322_v44 }
  0x29   : > { %325 = vst [vmem:[%s2509_s23 + $0x168] sm:$0xff] %v324_v45  ;;  %327 = vst [vmem:[%s2509_s23 + $0x170] sm:$0xff] %v326_v46 }
  0x2a   : > { %329 = vst [vmem:[%s2509_s23 + $0x178] sm:$0xff] %v328_v47 }
  0x2b PF: > { %p1822_p5 = scmp.ge.s32.totalorder %s2450_s11, 1  ;;  %p334_p6 = scmp.lt.s32.totalorder %s2450_s11, 3 }
  0x2d   : > { %p335_p7 = pnand %p1822_p5, %p334_p6 }
  0x2e   : > { %v666_v48 = vld [vmem:[%s3406_s1 + $0x80] sm:$0xff] (!%p335_p7)  ;;  %v667_v49 = vld [vmem:[%s3406_s1 + $0x88] sm:$0xff] (!%p335_p7)  ;;  %v668_v50 = vld [vmem:[%s3406_s1 + $0x90] sm:$0xff] (!%p335_p7)  ;;  %s341_s30 = sand.u32 (!%p335_p7), 1, %s2442_s9   ;;  %vm990_vm0 = vcmask (!%p335_p7), 523264   ;;  %s1823_s3 = sshll.u32 (!%p335_p7), %s1816_s12, 3 }
  0x2f   : > { %338 = sbr.rel (%p335_p7) target bundleno = 1417 (0x589), region = 62  ;;  %v2138_v51 = vpack.c.bf16 (!%p335_p7), %v667_v49, %v666_v48  ;;  %v669_v52 = vld [vmem:[%s3406_s1 + $0x98] sm:$0xff] (!%p335_p7)  ;;  %v670_v54 = vld [vmem:[%s3406_s1 + $0xa0] sm:$0xff] (!%p335_p7)  ;;  %v671_v55 = vld [vmem:[%s3406_s1 + $0xa8] sm:$0xff] (!%p335_p7)  ;;  %p364_p8 = scmp.lt.s32.totalorder (!%p335_p7), %s1823_s3, 15  ;;  %vm1745_vm1 = vcmask (!%p335_p7), 7168  }
  0x30   : > { %s2259_s5 = smul.u32 (!%p335_p7), 384, %s341_s30  ;;  %v2142_v53 = vpack.c.bf16 (!%p335_p7), %v669_v52, %v668_v50  ;;  %v2146_v56 = vpack.c.bf16 (!%p335_p7), %v671_v55, %v670_v54  ;;  %v672_v57 = vld [vmem:[%s3406_s1 + $0xb0] sm:$0xff] (!%p335_p7)  ;;  %v977_v58 = vld [vmem:[%s3406_s1 + $0x100] sm:$0xff] (!%p335_p7)  ;;  %v978_v59 = vld [vmem:[%s3406_s1 + $0x108] sm:$0xff] (!%p335_p7) }
  0x31   : > { %2139 = vmatprep.subr.bf16.mxu0 (!%p335_p7), %v2138_v51  ;;  %v673_v60 = vld [vmem:[%s3406_s1 + $0xb8] sm:$0xff] (!%p335_p7)  ;;  %v2202_v61 = vpack.c.bf16 (!%p335_p7), %v978_v59, %v977_v58  ;;  %v2640_v63 = vld [vmem:[%s3406_s1 + $0x1c1] ss:$0 sm:$0xff] (!%p335_p7)  ;;  %v2645_v0 = vld [vmem:[%s3406_s1 + $0x1c0] ss:$0 sm:$0xff] (!%p335_p7) }
  0x32   : > { %2141 = vmatpush3.bf16.msra.mxu0 (!%p335_p7), %v2138_v51  ;;  %s2634_s23 = scalar_lea.vmem (!%p335_p7), [#allocation2], %s2259_s5  ;;  %v2651_v2 = vld [vmem:[%s3406_s1 + $0x1c3] ss:$0 sm:$0xff] (!%p335_p7)  ;;  %v979_v3 = vld [vmem:[%s3406_s1 + $0x110] sm:$0xff] (!%p335_p7)  ;;  %v980_v4 = vld [vmem:[%s3406_s1 + $0x118] sm:$0xff] (!%p335_p7)  ;;  %v2150_v6 = vpack.c.bf16 (!%p335_p7), %v673_v60, %v672_v57 }
  0x33   : > { %2143 = vmatprep.subr.bf16.mxu0 (!%p335_p7), %v2142_v53  ;;  %v1825_v62 = vld [vmem:[%s2634_s23 + $0x40] sm:$0xff] (!%p335_p7)  ;;  %2203 = vmatprep.subr.bf16.mxu1 (!%p335_p7), %v2202_v61  ;;  %v2660_v5 = vld [vmem:[%s2634_s23 + $0x48] sm:$0xff] (!%p335_p7)  ;;  %v2206_v10 = vpack.c.bf16 (!%p335_p7), %v980_v4, %v979_v3  ;;  %v676_v11 = vld [vmem:[%s3406_s1 + $0xd0] sm:$0xff] (!%p335_p7) }
  0x34   : > { %v573_v1 = vmul.f32 (!%p335_p7), %v2640_v63, %v1825_v62  ;;  %v674_v7 = vld [vmem:[%s3406_s1 + $0xc0] sm:$0xff] (!%p335_p7)  ;;  %v675_v8 = vld [vmem:[%s3406_s1 + $0xc8] sm:$0xff] (!%p335_p7)  ;;  %2205 = vmatpush3.bf16.msra.mxu1 (!%p335_p7), %v2202_v61  ;;  %v459_v12 = vmul.f32 (!%p335_p7), %v2645_v0, %v1825_v62  ;;  %v574_v13 = vmul.f32 (!%p335_p7), %v2640_v63, %v2660_v5  ;;  %v983_v19 = vld [vmem:[%s3406_s1 + $0x130] sm:$0xff] (!%p335_p7)  ;;  %v460_v59 = vmul.f32 (!%p335_p7), %v2645_v0, %v2660_v5 }
  0x35   : > { %v981_v14 = vld [vmem:[%s3406_s1 + $0x120] sm:$0xff] (!%p335_p7)  ;;  %v982_v15 = vld [vmem:[%s3406_s1 + $0x128] sm:$0xff] (!%p335_p7)  ;;  %2207 = vmatprep.subr.bf16.mxu1 (!%p335_p7), %v2206_v10  ;;  %v984_v20 = vld [vmem:[%s3406_s1 + $0x138] sm:$0xff] (!%p335_p7)  ;;  %v2154_v25 = vpack.c.bf16 (!%p335_p7), %v675_v8, %v674_v7 }
  0x36   : > { %2145 = vmatpush3.bf16.msra.mxu0 %v2142_v53  ;;  %v2669_v9 = vadd.f32 %v2651_v2, %v573_v1  ;;  %v2687_v17 = vld [vmem:[%s3406_s1 + $0x1c2] ss:$0 sm:$0xff]  ;;  %v2210_v18 = vpack.c.bf16 %v982_v15, %v981_v14  ;;  %v677_v21 = vld [vmem:[%s3406_s1 + $0xd8] sm:$0xff]  ;;  %v2702_v23 = vadd.f32 %v2651_v2, %v574_v13  ;;  %v679_v26 = vld [vmem:[%s3406_s1 + $0xe8] sm:$0xff]  ;;  %v2214_v31 = vpack.c.bf16 %v984_v20, %v983_v19  ;;  %s3412_s3 = smov (!%p364_p8, %s1823_s3), 15 }
  0x37   : > { %2147 = vmatprep.subr.bf16.mxu0 %v2146_v56  ;;  %v678_v22 = vld [vmem:[%s3406_s1 + $0xe0] sm:$0xff]  ;;  %v680_v27 = vld [vmem:[%s3406_s1 + $0xf0] sm:$0xff]  ;;  %v681_v28 = vld [vmem:[%s3406_s1 + $0xf8] sm:$0xff]  ;;  %v2721_v33 = vadd.f32 %v2687_v17, %v459_v12  ;;  %v2158_v34 = vpack.c.bf16 %v677_v21, %v676_v11  ;;  %v2802_v19 = vadd.f32 %v2687_v17, %v460_v59  ;;  %s1824_s11 = sshll.u32 %s3412_s3, 3 }
  0x38   : > { %v602_v16 = vmul.f32 0.044715, %v2669_v9  ;;  %v369_v24 = vld [vmem:[%s2634_s23] sm:$0xff]  ;;  %2209 = vmatpush3.bf16.msra.mxu1 %v2206_v10  ;;  %v603_v30 = vmul.f32 0.044715, %v2702_v23  ;;  %v2718_v32 = vld [vmem:[%s2634_s23 + $0x50] sm:$0xff]  ;;  %v2729_v38 = vpack.c.bf16 %v679_v26, %v678_v22  ;;  %v2731_v39 = vpack.c.bf16 %v681_v28, %v680_v27  ;;  %s367_s5 = scalar_lea.vmem %s3407_s2, %s1824_s11 }
  0x39   : > { %2211 = vmatprep.subr.bf16.mxu1 %v2210_v18  ;;  %2082 = vmatprep.mubr.msk.f32.mxu1 %vm990_vm0, %v369_v24  ;;  %v575_v36 = vmul.f32 %v2640_v63, %v2718_v32  ;;  %v2727_v37 = vld [vmem:[%s2634_s23 + $0x58] sm:$0xff]  ;;  %v552_v40 = vld [vmem:[%s3406_s1] sm:$0xff]  ;;  %v553_v41 = vld [vmem:[%s3406_s1 + $0x8] sm:$0xff]  ;;  %v488_v54 = vmul.f32 0.044715, %v2721_v33 }
  0x3a   : > { %2149 = vmatpush3.bf16.msra.mxu0 %v2146_v56  ;;  %v610_v29 = vmul.f32 %v602_v16, %v2669_v9  ;;  %v611_v42 = vmul.f32 %v603_v30, %v2702_v23  ;;  %v576_v43 = vmul.f32 %v2640_v63, %v2727_v37  ;;  %v2743_v44 = vld [vmem:[%s2634_s23 + $0x60] sm:$0xff]  ;;  %v2752_v48 = vld [vmem:[%s2634_s23 + $0x68] sm:$0xff]  ;;  %v554_v50 = vld [vmem:[%s3406_s1 + $0x10] sm:$0xff]  ;;  %v2767_v56 = vpack.c.bf16 %v553_v41, %v552_v40 }
  0x3b   : > { %2151 = vmatprep.subr.bf16.mxu0 %v2150_v6  ;;  %v2747_v46 = vadd.f32 %v2651_v2, %v575_v36  ;;  %v577_v47 = vmul.f32 %v2640_v63, %v2743_v44  ;;  %v555_v51 = vld [vmem:[%s3406_s1 + $0x18] sm:$0xff]  ;;  %v578_v53 = vmul.f32 %v2640_v63, %v2752_v48  ;;  %v2781_v1 = vld [vmem:[%s2634_s23 + $0x70] sm:$0xff]  ;;  %v496_v13 = vmul.f32 %v488_v54, %v2721_v33  ;;  %v373_v27 = vld [vmem:[%s2634_s23 + $0x20] sm:$0xff] }
  0x3c   : > { %v618_v35 = vmul.f32 %v610_v29, %v2669_v9  ;;  %2213 = vmatpush3.bf16.msra.mxu1 %v2210_v18  ;;  %v619_v49 = vmul.f32 %v611_v42, %v2702_v23  ;;  %v2762_v52 = vadd.f32 %v2651_v2, %v576_v43  ;;  %v2784_v3 = vld [vmem:[%s2634_s23 + $0x78] sm:$0xff]  ;;  %v2786_v4 = vpack.c.bf16 %v555_v51, %v554_v50  ;;  %v371_v10 = vld [vmem:[%s2634_s23 + $0x10] sm:$0xff]  ;;  %v374_v43 = vld [vmem:[%s2634_s23 + $0x28] sm:$0xff] }
  0x3d   : > { %2215 = vmatprep.subr.bf16.mxu1 %v2214_v31  ;;  %v604_v57 = vmul.f32 0.044715, %v2747_v46  ;;  %v2771_v58 = vadd.f32 %v2651_v2, %v577_v47  ;;  %v2778_v62 = vadd.f32 %v2651_v2, %v578_v53  ;;  %v579_v16 = vmul.f32 %v2640_v63, %v2781_v1  ;;  %v372_v22 = vld [vmem:[%s2634_s23 + $0x18] sm:$0xff]  ;;  %v375_v50 = vld [vmem:[%s2634_s23 + $0x30] sm:$0xff]  ;;  %v556_v54 = vld [vmem:[%s3406_s1 + $0x20] sm:$0xff] }
  0x3e   : > { %2153 = vmatpush3.bf16.msra.mxu0 %v2150_v6  ;;  %v626_v45 = vadd.f32 %v618_v35, %v2669_v9  ;;  %v627_v60 = vadd.f32 %v619_v49, %v2702_v23  ;;  %v605_v61 = vmul.f32 0.044715, %v2762_v52  ;;  %v370_v6 = vld [vmem:[%s2634_s23 + $0x8] sm:$0xff]  ;;  %v580_v18 = vmul.f32 %v2640_v63, %v2784_v3 }
  0x3f   : > { %2155 = vmatprep.subr.bf16.mxu0 %v2154_v25  ;;  %v612_v7 = vmul.f32 %v604_v57, %v2747_v46  ;;  %v606_v5 = vmul.f32 0.044715, %v2771_v58  ;;  %v607_v12 = vmul.f32 0.044715, %v2778_v62  ;;  %v504_v30 = vmul.f32 %v496_v13, %v2721_v33 }
  0x40   : > { %v634_v55 = vmul.f32 0.7978846, %v626_v45  ;;  %2217 = vmatpush3.bf16.msra.mxu1 %v2214_v31  ;;  %v635_v8 = vmul.f32 0.7978846, %v627_v60  ;;  %v613_v11 = vmul.f32 %v605_v61, %v2762_v52  ;;  %v2819_v29 = vadd.f32 %v2651_v2, %v580_v18 }
  0x41   : > { %v620_v14 = vmul.f32 %v612_v7, %v2747_v46  ;;  %v614_v15 = vmul.f32 %v606_v5, %v2771_v58  ;;  %v615_v21 = vmul.f32 %v607_v12, %v2778_v62  ;;  %v594_v31 = vmul.f32 0.5, %v2669_v9  ;;  %v376_v5 = vld [vmem:[%s2634_s23 + $0x38] sm:$0xff] }
  0x42   : > { %2157 = vmatpush3.bf16.msra.mxu0 %v2154_v25  ;;  %2284 = vtanh.f32 %v634_v55  ;;  %v621_v20 = vmul.f32 %v613_v11, %v2762_v52  ;;  %v2813_v25 = vadd.f32 %v2651_v2, %v579_v16  ;;  %v609_v2 = vmul.f32 0.044715, %v2819_v29  ;;  %v557_v55 = vld [vmem:[%s3406_s1 + $0x28] sm:$0xff] }
  0x43   : > { %2159 = vmatprep.subr.bf16.mxu0 %v2158_v34  ;;  %2286 = vtanh.f32 %v635_v8  ;;  %2083 = vmatmul.mubr.msk.f32.vlgmr.msra.gmra.mrb[0].mxu1 %vm990_vm0, %v370_v6  ;;  %v628_v24 = vadd.f32 %v620_v14, %v2747_v46  ;;  %v622_v63 = vmul.f32 %v614_v15, %v2771_v58  ;;  %v623_v28 = vmul.f32 %v615_v21, %v2778_v62 }
  0x44   : > { %2085 = vmatprep.mubr.msk.f32.mxu1 %vm990_vm0, %v371_v10  ;;  %v629_v26 = vadd.f32 %v621_v20, %v2762_v52  ;;  %v608_v36 = vmul.f32 0.044715, %v2813_v25  ;;  %v489_v42 = vmul.f32 0.044715, %v2802_v19  ;;  %v595_v47 = vmul.f32 0.5, %v2702_v23 }
  0x45   : > { %v630_v35 = vadd.f32 %v622_v63, %v2771_v58  ;;  %v631_v41 = vadd.f32 %v623_v28, %v2778_v62  ;;  %v617_v51 = vmul.f32 %v609_v2, %v2819_v29  ;;  %v461_v23 = vmul.f32 %v2645_v0, %v2718_v32  ;;  %v559_v2 = vld [vmem:[%s3406_s1 + $0x38] sm:$0xff] }
  0x46   : > { %2161 = vmatpush3.bf16.msra.mxu0 %v2158_v34  ;;  %v636_v34 = vmul.f32 0.7978846, %v628_v24  ;;  %v637_v40 = vmul.f32 0.7978846, %v629_v26  ;;  %v616_v45 = vmul.f32 %v608_v36, %v2813_v25  ;;  %v497_v6 = vmul.f32 %v489_v42, %v2802_v19 }
  0x47   : > { %2163 = vmatprep.subr.bf16.mxu0 %v2729_v38  ;;  %2086 = vmatmul.mubr.msk.f32.gmra.mrb[2].mxu1 %vm990_vm0, %v372_v22  ;;  %v638_v9 = vmul.f32 0.7978846, %v630_v35  ;;  %v639_v49 = vmul.f32 0.7978846, %v631_v41  ;;  %v625_v61 = vmul.f32 %v617_v51, %v2819_v29  ;;  %v2856_v32 = vadd.f32 %v2687_v17, %v461_v23  ;;  %v560_v23 = vld [vmem:[%s3406_s1 + $0x40] sm:$0xff] }
  0x48   : > { %2288 = vtanh.f32 %v636_v34  ;;  %2088 = vmatprep.mubr.msk.f32.mxu1 %vm990_vm0, %v373_v27  ;;  %v624_v57 = vmul.f32 %v616_v45, %v2813_v25  ;;  %v2860_v11 = vpack.c.bf16 %v557_v55, %v556_v54  ;;  %v463_v13 = vmul.f32 %v2645_v0, %v2743_v44 }
  0x49   : > { %2290 = vtanh.f32 %v637_v40  ;;  %v633_v12 = vadd.f32 %v625_v61, %v2819_v29  ;;  %v596_v15 = vmul.f32 0.5, %v2747_v46  ;;  %v490_v18 = vmul.f32 0.044715, %v2856_v32 }
  0x4a   : > { %2165 = vmatpush3.bf16.msra.mxu0 %v2729_v38  ;;  %v512_v38 = vadd.f32 %v504_v30, %v2721_v33  ;;  %2292 = vtanh.f32 %v638_v9  ;;  %v632_v7 = vadd.f32 %v624_v57, %v2813_v25  ;;  %v2873_v22 = vadd.f32 %v2687_v17, %v463_v13 }
  0x4b   : > { %2167 = vmatprep.subr.bf16.mxu0 %v2731_v39  ;;  %2089 = vmatmul.mubr.msk.f32.gmra.mrb[4].mxu1 %vm990_vm0, %v374_v43  ;;  %2294 = vtanh.f32 %v639_v49  ;;  %v641_v20 = vmul.f32 0.7978846, %v633_v12  ;;  %v498_v44 = vmul.f32 %v490_v18, %v2856_v32  ;;  %v464_v46 = vmul.f32 %v2645_v0, %v2752_v48 }
  0x4c   : > { %v2285_v53 = vpop.eup %2284  ;;  %v520_v59 = vmul.f32 0.7978846, %v512_v38  ;;  %2091 = vmatprep.mubr.msk.f32.mxu1 %vm990_vm0, %v375_v50  ;;  %v640_v16 = vmul.f32 0.7978846, %v632_v7  ;;  %v597_v63 = vmul.f32 0.5, %v2762_v52  ;;  %v598_v26 = vmul.f32 0.5, %v2771_v58 }
  0x4d   : > { %v650_v60 = vadd.f32 1.0, %v2285_v53  ;;  %v2287_v8 = vpop.eup %2286  ;;  %v599_v30 = vmul.f32 0.5, %v2778_v62  ;;  %v492_v34 = vmul.f32 0.044715, %v2873_v22  ;;  %v2885_v35 = vadd.f32 %v2687_v17, %v464_v46  ;;  %v558_v62 = vld [vmem:[%s3406_s1 + $0x30] sm:$0xff] }
  0x4e   : > { %2169 = vmatpush3.bf16.msra.mxu0 %v2731_v39  ;;  %2296 = vtanh.f32 %v520_v59  ;;  %v462_v39 = vmul.f32 %v2645_v0, %v2727_v37  ;;  %v651_v14 = vadd.f32 1.0, %v2287_v8  ;;  %v505_v37 = vmul.f32 %v497_v6, %v2802_v19 }
  0x4f   : > { %2171 = vmatprep.subr.bf16.mxu0 %v2767_v56  ;;  %v658_v10 = vmul.f32 %v650_v60, %v594_v31  ;;  %2092 = vmatmul.mubr.msk.f32.gmra.mrb[6].mxu1 %vm990_vm0, %v376_v5  ;;  %2298 = vtanh.f32 %v640_v16  ;;  %v506_v31 = vmul.f32 %v498_v44, %v2856_v32  ;;  %v465_v40 = vmul.f32 %v2645_v0, %v2781_v1 }
  0x50   : > { %v2870_v21 = vadd.f32 %v2687_v17, %v462_v39  ;;  %v659_v24 = vmul.f32 %v651_v14, %v595_v47  ;;  %2300 = vtanh.f32 %v641_v20  ;;  %v513_v52 = vadd.f32 %v505_v37, %v2802_v19  ;;  %v563_v37 = vld [vmem:[%s3406_s1 + $0x58] sm:$0xff] }
  0x51   : > { %2010 = vmatprep.mubr.f32.mxu0 %v658_v10  ;;  %v514_v42 = vadd.f32 %v506_v31, %v2856_v32  ;;  %v500_v9 = vmul.f32 %v492_v34, %v2873_v22  ;;  %v466_v43 = vmul.f32 %v2645_v0, %v2784_v3  ;;  %v493_v49 = vmul.f32 0.044715, %v2885_v35 }
  0x52   : > { %v491_v27 = vmul.f32 0.044715, %v2870_v21  ;;  %v2289_v28 = vpop.eup %2288  ;;  %2011 = vmatmul.mubr.f32.vlgmr.msra.gmra.mrb[0].mxu0 %v659_v24  ;;  %v480_v54 = vmul.f32 0.5, %v2721_v33  ;;  %v2182_v57 = vpack.c.bf16 %v559_v2, %v558_v62  ;;  %v521_v0 = vmul.f32 0.7978846, %v513_v52  ;;  %v561_v33 = vld [vmem:[%s3406_s1 + $0x48] sm:$0xff] }
  0x53   : > { %v2291_v36 = vpop.eup %2290  ;;  %2173 = vmatpush3.bf16.msra.mxu0 %v2767_v56  ;;  %v652_v48 = vadd.f32 1.0, %v2289_v28  ;;  %v508_v55 = vmul.f32 %v500_v9, %v2873_v22  ;;  %v501_v3 = vmul.f32 %v493_v49, %v2885_v35  ;;  %v522_v61 = vmul.f32 0.7978846, %v514_v42  ;;  %v566_v2 = vld [vmem:[%s3406_s1 + $0x70] sm:$0xff] }
  0x54   : > { %v499_v58 = vmul.f32 %v491_v27, %v2870_v21  ;;  %v2293_v41 = vpop.eup %2292  ;;  %2175 = vmatprep.subr.bf16.mxu0 %v2786_v4  ;;  %v653_v56 = vadd.f32 1.0, %v2291_v36  ;;  %v2918_v6 = vadd.f32 %v2687_v17, %v465_v40  ;;  %v2923_v8 = vadd.f32 %v2687_v17, %v466_v43  ;;  %v564_v36 = vld [vmem:[%s3406_s1 + $0x60] sm:$0xff] }
  0x55   : > { %v2295_v1 = vpop.eup %2294  ;;  %v660_v45 = vmul.f32 %v652_v48, %v596_v15  ;;  %v654_v38 = vadd.f32 1.0, %v2293_v41  ;;  %v509_v39 = vmul.f32 %v501_v3, %v2885_v35  ;;  %v601_v12 = vmul.f32 0.5, %v2819_v29  ;;  %v562_v29 = vld [vmem:[%s3406_s1 + $0x50] sm:$0xff]  ;;  %v565_v48 = vld [vmem:[%s3406_s1 + $0x68] sm:$0xff] }
  0x56   : > { %v507_v47 = vmul.f32 %v499_v58, %v2870_v21  ;;  %v661_v51 = vmul.f32 %v653_v56, %v597_v63  ;;  %v655_v53 = vadd.f32 1.0, %v2295_v1  ;;  %v516_v13 = vadd.f32 %v508_v55, %v2873_v22  ;;  %v567_v56 = vld [vmem:[%s3406_s1 + $0x78] sm:$0xff] }
  0x57   : > { %2177 = vmatpush3.bf16.msra.mxu0 %v2786_v4  ;;  %2013 = vmatprep.mubr.f32.mxu0 %v660_v45  ;;  %v662_v59 = vmul.f32 %v654_v38, %v598_v26  ;;  %v600_v4 = vmul.f32 0.5, %v2813_v25  ;;  %v494_v25 = vmul.f32 0.044715, %v2918_v6  ;;  %v2186_v15 = vpack.c.bf16 %v561_v33, %v560_v23 }
  0x58   : > { %v2297_v50 = vpop.eup %2296  ;;  %2179 = vmatprep.subr.bf16.mxu0 %v2860_v11  ;;  %2014 = vmatmul.mubr.f32.gmra.mrb[2].mxu0 %v661_v51  ;;  %v663_v60 = vmul.f32 %v655_v53, %v599_v30  ;;  %v515_v5 = vadd.f32 %v507_v47, %v2870_v21  ;;  %2302 = vtanh.f32 %v521_v0  ;;  %v495_v20 = vmul.f32 0.044715, %v2923_v8 }
  0x59   : > { %2016 = vmatprep.mubr.f32.mxu0 %v662_v59  ;;  %v536_v7 = vadd.f32 1.0, %v2297_v50  ;;  %v2299_v10 = vpop.eup %2298  ;;  %2304 = vtanh.f32 %v522_v61  ;;  %v502_v17 = vmul.f32 %v494_v25, %v2918_v6  ;;  %v517_v46 = vadd.f32 %v509_v39, %v2885_v35 }
  0x5a   : > { %v2301_v14 = vpop.eup %2300  ;;  %v656_v16 = vadd.f32 1.0, %v2299_v10  ;;  %v523_v44 = vmul.f32 0.7978846, %v515_v5  ;;  %v524_v26 = vmul.f32 0.7978846, %v516_v13  ;;  %v503_v28 = vmul.f32 %v495_v20, %v2923_v8  ;;  %v1833_v20 = vld [vmem:[%s2634_s23 + $0x80] sm:$0xff] }
  0x5b   : > { %2181 = vmatpush3.bf16.msra.mxu0 %v2860_v11  ;;  %v657_v18 = vadd.f32 1.0, %v2301_v14  ;;  %v544_v24 = vmul.f32 %v536_v7, %v480_v54  ;;  %v510_v27 = vmul.f32 %v502_v17, %v2918_v6  ;;  %v2190_v30 = vpack.c.bf16 %v563_v37, %v562_v29  ;;  %v1834_v29 = vld [vmem:[%s2634_s23 + $0x88] sm:$0xff] }
  0x5c   : > { %2183 = vmatprep.subr.bf16.mxu0 %v2182_v57  ;;  %2017 = vmatmul.mubr.f32.gmra.mrb[4].mxu0 %v663_v60  ;;  %v664_v11 = vmul.f32 %v656_v16, %v600_v4  ;;  %v511_v34 = vmul.f32 %v503_v28, %v2923_v8  ;;  %2306 = vtanh.f32 %v523_v44  ;;  %v525_v52 = vmul.f32 0.7978846, %v517_v46  ;;  %v1842_v37 = vld [vmem:[%s2634_s23 + $0xc8] sm:$0xff]  ;;  %v1836_v44 = vld [vmem:[%s2634_s23 + $0x98] sm:$0xff] }
  0x5d   : > { %v665_v63 = vmul.f32 %v657_v18, %v601_v12  ;;  %v518_v31 = vadd.f32 %v510_v27, %v2918_v6  ;;  %2308 = vtanh.f32 %v524_v26  ;;  %v2194_v41 = vpack.c.bf16 %v565_v48, %v564_v36  ;;  %v1844_v46 = vld [vmem:[%s2634_s23 + $0xd8] sm:$0xff] }
  0x5e   : > { %2019 = vmatprep.mubr.f32.mxu0 %v664_v11  ;;  %v519_v40 = vadd.f32 %v511_v34, %v2923_v8  ;;  %2310 = vtanh.f32 %v525_v52  ;;  %v2198_v43 = vpack.c.bf16 %v567_v56, %v566_v2  ;;  %v481_v1 = vmul.f32 0.5, %v2802_v19  ;;  %v1849_v52 = vld [vmem:[%s2634_s23 + $0x100] sm:$0xff]  ;;  %v1843_v2 = vld [vmem:[%s2634_s23 + $0xd0] sm:$0xff] }
  0x5f   : > { %2185 = vmatpush3.bf16.msra.mxu0 %v2182_v57  ;;  %v526_v58 = vmul.f32 0.7978846, %v518_v31  ;;  %v482_v47 = vmul.f32 0.5, %v2856_v32  ;;  %v483_v53 = vmul.f32 0.5, %v2870_v21  ;;  %v484_v59 = vmul.f32 0.5, %v2873_v22  ;;  %v1850_v31 = vld [vmem:[%s2634_s23 + $0x108] sm:$0xff] }
  0x60   : > { %2187 = vmatprep.subr.bf16.mxu0 %v2186_v15  ;;  %2020 = vmatmul.mubr.f32.gmra.mrb[6].mxu0 %v665_v63  ;;  %v527_v42 = vmul.f32 0.7978846, %v519_v40  ;;  %v485_v23 = vmul.f32 0.5, %v2885_v35  ;;  %v486_v4 = vmul.f32 0.5, %v2918_v6  ;;  %v487_v7 = vmul.f32 0.5, %v2923_v8 }
  0x61   : > { %2054 = vmatprep.mubr.f32.mxu0 %v544_v24  ;;  %2312 = vtanh.f32 %v526_v58  ;;  %v1841_v24 = vld [vmem:[%s2634_s23 + $0xc0] sm:$0xff]  ;;  %v405_v27 = vadd.f32 %v1842_v37, %v1834_v29  ;;  %v407_v34 = vadd.f32 %v1844_v46, %v1836_v44  ;;  %v1852_v58 = vld [vmem:[%s2634_s23 + $0x118] sm:$0xff] }
  0x62   : > { %v2303_v62 = vpop.eup %2302  ;;  %2314 = vtanh.f32 %v527_v42  ;;  %v1853_v29 = vld [vmem:[%s2634_s23 + $0x120] sm:$0xff] }
  0x63   : > { %2189 = vmatpush3.bf16.msra.mxu0 %v2186_v15  ;;  %v2305_v9 = vpop.eup %2304  ;;  %v537_v45 = vadd.f32 1.0, %v2303_v62  ;;  %v1870_v15 = vld [vmem:[%s3406_s1 + $0x1c5] ss:$0 sm:$0xff]  ;;  %v1835_v62 = vld [vmem:[%s2634_s23 + $0x90] sm:$0xff]  ;;  %v422_v42 = vadd.f32 %v1850_v31, %v405_v27  ;;  %v1862_v27 = vld [vmem:[%s2634_s23 + $0x168] sm:$0xff] }
  0x64   : > { %2191 = vmatprep.subr.bf16.mxu0 %v2190_v30  ;;  %v538_v49 = vadd.f32 1.0, %v2305_v9  ;;  %v1848_v31 = vld [vmem:[%s2634_s23 + $0xf8] sm:$0xff] }
  0x65   : > { %v545_v51 = vmul.f32 %v537_v45, %v481_v1  ;;  %v1857_v1 = vld [vmem:[%s2634_s23 + $0x140] sm:$0xff]  ;;  %v1858_v45 = vld [vmem:[%s2634_s23 + $0x148] sm:$0xff] }
  0x66   : > { %v2307_v38 = vpop.eup %2306  ;;  %v546_v57 = vmul.f32 %v538_v49, %v482_v47  ;;  %v406_v49 = vadd.f32 %v1843_v2, %v1835_v62 }
  0x67   : > { %2193 = vmatpush3.bf16.msra.mxu0 %v2190_v30  ;;  %v2309_v50 = vpop.eup %2308  ;;  %v539_v54 = vadd.f32 1.0, %v2307_v38  ;;  %v404_v30 = vadd.f32 %v1841_v24, %v1833_v20  ;;  %v424_v38 = vadd.f32 %v1852_v58, %v407_v34 }
  0x68   : > { %2195 = vmatprep.subr.bf16.mxu0 %v2194_v41  ;;  %v2311_v55 = vpop.eup %2310  ;;  %v540_v0 = vadd.f32 1.0, %v2309_v50 }
  0x69   : > { %v547_v19 = vmul.f32 %v539_v54, %v483_v53  ;;  %v541_v33 = vadd.f32 1.0, %v2311_v55  ;;  %v1838_v53 = vld [vmem:[%s2634_s23 + $0xa8] sm:$0xff] }
  0x6a   : > { %v548_v60 = vmul.f32 %v540_v0, %v484_v59  ;;  %v1846_v54 = vld [vmem:[%s2634_s23 + $0xe8] sm:$0xff]  ;;  %v1851_v59 = vld [vmem:[%s2634_s23 + $0x110] sm:$0xff] }
  0x6b   : > { %2197 = vmatpush3.bf16.msra.mxu0 %v2194_v41  ;;  %v2313_v3 = vpop.eup %2312  ;;  %v549_v21 = vmul.f32 %v541_v33, %v485_v23  ;;  %v1845_v23 = vld [vmem:[%s2634_s23 + $0xe0] sm:$0xff] }
  0x6c   : > { %2199 = vmatprep.subr.bf16.mxu0 %v2198_v43  ;;  %v2315_v32 = vpop.eup %2314  ;;  %v542_v61 = vadd.f32 1.0, %v2313_v3  ;;  %v439_v3 = vadd.f32 %v1858_v45, %v422_v42 }
  0x6d   : > { %v543_v5 = vadd.f32 1.0, %v2315_v32 }
  0x6e   : > { %v550_v22 = vmul.f32 %v542_v61, %v486_v4  ;;  %v409_v4 = vadd.f32 %v1846_v54, %v1838_v53  ;;  %v3025_v20 = vmul.f32 0.25, %v439_v3 }
  0x6f   : > { %2201 = vmatpush3.bf16.msra.mxu0 %v2198_v43  ;;  %v551_v39 = vmul.f32 %v543_v5, %v487_v7  ;;  %v421_v43 = vadd.f32 %v1849_v52, %v404_v30  ;;  %v1854_v5 = vld [vmem:[%s2634_s23 + $0x128] sm:$0xff]  ;;  %v1840_v30 = vld [vmem:[%s2634_s23 + $0xb8] sm:$0xff] }
  0x70   : > { %v426_v46 = vadd.f32 %v1854_v5, %v409_v4  ;;  %v3055_v45 = vadd.f32 %v1848_v31, %v1840_v30 }
  0x71   : > { %v438_v33 = vadd.f32 %v1857_v1, %v421_v43 }
  0x72   : > { %2055 = vmatmul.mubr.f32.vlgmr.msra.gmra.mrb[0].mxu0 %v545_v51  ;;  %v1860_v51 = vld [vmem:[%s2634_s23 + $0x158] sm:$0xff]  ;;  %v3053_v1 = vadd.f32 %v1862_v27, %v426_v46 }
  0x73   : > { %2057 = vmatprep.mubr.f32.mxu0 %v546_v57  ;;  %v441_v32 = vadd.f32 %v1860_v51, %v424_v38 }
  0x75   : > { %v3030_v24 = vmul.f32 0.25, %v441_v32 }
  0x76   : > { %2058 = vmatmul.mubr.f32.gmra.mrb[2].mxu0 %v547_v19  ;;  %v1837_v19 = vld [vmem:[%s2634_s23 + $0xa0] sm:$0xff] }
  0x77   : > { %2060 = vmatprep.mubr.f32.mxu0 %v548_v60 }
  0x7a   : > { %2061 = vmatmul.mubr.f32.gmra.mrb[4].mxu0 %v549_v21  ;;  %v423_v21 = vadd.f32 %v1851_v59, %v406_v49 }
  0x7b   : > { %2063 = vmatprep.mubr.f32.mxu0 %v550_v22 }
  0x7e   : > { %2064 = vmatmul.mubr.f32.gmra.mrb[6].mxu0 %v551_v39  ;;  %v3016_v39 = vld [vmem:[%s3406_s1 + $0x1c4] ss:$0 sm:$0xff] }
 0x116   : > { %v2084_v35 = vpop.f32.mrb[0].mxu1 }
 0x117   : > { %v1081_v10 = vpop.f32.mrb[1].mxu1  ;;  %v2965_v16 = vadd.f32 %v2084_v35, %v1870_v15 }
 0x118   : > { %v2967_v18 = vadd.f32 %v1870_v15, %v1081_v10  ;;  %v1859_v10 = vld [vmem:[%s2634_s23 + $0x150] sm:$0xff] }
 0x119   : > { %v1129_v11 = vmul.f32 0.044715, %v2965_v16 }
 0x11a   : > { %v2087_v6 = vpop.f32.mrb[2].mxu1  ;;  %v1128_v63 = vmul.f32 0.044715, %v2967_v18 }
 0x11b   : > { %v1091_v12 = vpop.f32.mrb[3].mxu1  ;;  %v2969_v17 = vadd.f32 %v2087_v6, %v1870_v15  ;;  %v1137_v36 = vmul.f32 %v1129_v11, %v2965_v16  ;;  %v408_v6 = vadd.f32 %v1845_v23, %v1837_v19  ;;  %v3028_v11 = vmul.f32 0.25, %v438_v33 }
 0x11c   : > { %v2979_v26 = vadd.f32 %v1870_v15, %v1091_v12  ;;  %v1136_v40 = vmul.f32 %v1128_v63, %v2967_v18 }
 0x11d   : > { %v1131_v28 = vmul.f32 0.044715, %v2969_v17  ;;  %v1145_v50 = vmul.f32 %v1137_v36, %v2965_v16  ;;  %v3045_v52 = vadd.f32 %v1853_v29, %v408_v6 }
 0x11e   : > { %v2090_v13 = vpop.f32.mrb[4].mxu1  ;;  %v1130_v56 = vmul.f32 0.044715, %v2979_v26  ;;  %v1144_v57 = vmul.f32 %v1136_v40, %v2967_v18 }
 0x11f   : > { %v1101_v25 = vpop.f32.mrb[5].mxu1  ;;  %v2984_v48 = vadd.f32 %v2090_v13, %v1870_v15  ;;  %v1139_v9 = vmul.f32 %v1131_v28, %v2969_v17  ;;  %v1153_v7 = vadd.f32 %v1145_v50, %v2965_v16 }
 0x120   : > { %v2989_v41 = vadd.f32 %v1870_v15, %v1101_v25  ;;  %v1138_v0 = vmul.f32 %v1130_v56, %v2979_v26  ;;  %v1152_v35 = vadd.f32 %v1144_v57, %v2967_v18 }
 0x121   : > { %v1133_v47 = vmul.f32 0.044715, %v2984_v48  ;;  %v1147_v60 = vmul.f32 %v1139_v9, %v2969_v17 }
 0x122   : > { %v2093_v8 = vpop.f32.mrb[6].mxu1  ;;  %v1132_v55 = vmul.f32 0.044715, %v2989_v41  ;;  %v1146_v25 = vmul.f32 %v1138_v0, %v2979_v26  ;;  %v1160_v36 = vmul.f32 0.7978846, %v1152_v35 }
 0x123   : > { %v1111_v14 = vpop.f32.mrb[7].mxu1  ;;  %v1141_v61 = vmul.f32 %v1133_v47, %v2984_v48  ;;  %v3020_v12 = vadd.f32 %v2093_v8, %v1870_v15  ;;  %v1155_v44 = vadd.f32 %v1147_v60, %v2969_v17 }
 0x124   : > { %v1140_v22 = vmul.f32 %v1132_v55, %v2989_v41  ;;  %v3022_v13 = vadd.f32 %v1870_v15, %v1111_v14  ;;  %v3036_v14 = vadd.f32 %v1859_v10, %v423_v21  ;;  %v1161_v15 = vmul.f32 0.7978846, %v1153_v7 }
 0x125   : > { %v1149_v28 = vmul.f32 %v1141_v61, %v2984_v48  ;;  %v1135_v40 = vmul.f32 0.044715, %v3020_v12  ;;  %v1154_v56 = vadd.f32 %v1146_v25, %v2979_v26  ;;  %v1163_v43 = vmul.f32 0.7978846, %v1155_v44 }
 0x126   : > { %v1148_v58 = vmul.f32 %v1140_v22, %v2989_v41  ;;  %v1134_v62 = vmul.f32 0.044715, %v3022_v13  ;;  %2316 = vtanh.f32 %v1161_v15 }
 0x127   : > { %v1157_v50 = vadd.f32 %v1149_v28, %v2984_v48  ;;  %2318 = vtanh.f32 %v1160_v36  ;;  %v1162_v0 = vmul.f32 0.7978846, %v1154_v56  ;;  %v1143_v3 = vmul.f32 %v1135_v40, %v3020_v12  ;;  %v1861_v40 = vld [vmem:[%s2634_s23 + $0x160] sm:$0xff] }
 0x128   : > { %v1156_v54 = vadd.f32 %v1148_v58, %v2989_v41  ;;  %v1142_v55 = vmul.f32 %v1134_v62, %v3022_v13  ;;  %2320 = vtanh.f32 %v1163_v43  ;;  %v1847_v43 = vld [vmem:[%s2634_s23 + $0xf0] sm:$0xff] }
 0x129   : > { %v1165_v21 = vmul.f32 0.7978846, %v1157_v50  ;;  %2322 = vtanh.f32 %v1162_v0 }
 0x12a   : > { %v1164_v35 = vmul.f32 0.7978846, %v1156_v54  ;;  %v1150_v29 = vmul.f32 %v1142_v55, %v3022_v13  ;;  %v1151_v54 = vmul.f32 %v1143_v3, %v3020_v12 }
 0x130   : > { %v3099_v62 = vpop.eup %2316 }
 0x145   : > { %v2056_v37 = vpop.f32.mrb[0].mxu0 }
 0x146   : > { %v3034_v8 = vadd.f32 %v2056_v37, %v3016_v39  ;;  %v853_v63 = vpop.f32.mrb[1].mxu0 }
 0x147   : > { %v3043_v34 = vadd.f32 %v3016_v39, %v853_v63 }
 0x148   : > { %v914_v2 = vmul.f32 0.044715, %v3034_v8 }
 0x149   : > { %v913_v42 = vmul.f32 0.044715, %v3043_v34  ;;  %v2059_v9 = vpop.f32.mrb[2].mxu0 }
 0x14a   : > { %v922_v38 = vmul.f32 %v914_v2, %v3034_v8  ;;  %v3059_v47 = vadd.f32 %v2059_v9, %v3016_v39  ;;  %v863_v49 = vpop.f32.mrb[3].mxu0  ;;  %v1839_v9 = vld [vmem:[%s2634_s23 + $0xb0] sm:$0xff] }
 0x14b   : > { %v921_v51 = vmul.f32 %v913_v42, %v3043_v34  ;;  %v3064_v53 = vadd.f32 %v3016_v39, %v863_v49  ;;  %v2319_v49 = vpop.eup %2318 }
 0x14c   : > { %v930_v57 = vmul.f32 %v922_v38, %v3034_v8  ;;  %v916_v59 = vmul.f32 0.044715, %v3059_v47  ;;  %v1158_v38 = vadd.f32 %v1150_v29, %v3022_v13  ;;  %v2321_v0 = vpop.eup %2320 }
 0x14d   : > { %v929_v19 = vmul.f32 %v921_v51, %v3043_v34  ;;  %v915_v23 = vmul.f32 0.044715, %v3064_v53  ;;  %v2062_v33 = vpop.f32.mrb[4].mxu0  ;;  %v2323_v29 = vpop.eup %2322 }
 0x14e   : > { %v924_v32 = vmul.f32 %v916_v59, %v3059_v47  ;;  %v3075_v60 = vadd.f32 %v2062_v33, %v3016_v39  ;;  %v873_v4 = vpop.f32.mrb[5].mxu0  ;;  %v938_v61 = vadd.f32 %v930_v57, %v3034_v8  ;;  %v442_v57 = vadd.f32 %v1861_v40, %v3045_v52 }
 0x14f   : > { %v923_v7 = vmul.f32 %v915_v23, %v3064_v53  ;;  %v3080_v5 = vadd.f32 %v3016_v39, %v873_v4  ;;  %v937_v22 = vadd.f32 %v929_v19, %v3043_v34  ;;  %v410_v33 = vadd.f32 %v1847_v43, %v1839_v9 }
 0x150   : > { %v932_v10 = vmul.f32 %v924_v32, %v3059_v47  ;;  %v918_v6 = vmul.f32 0.044715, %v3075_v60  ;;  %v946_v25 = vmul.f32 0.7978846, %v938_v61  ;;  %v1855_v61 = vld [vmem:[%s2634_s23 + $0x130] sm:$0xff]  ;;  %v906_v9 = vmul.f32 0.5, %v3034_v8 }
 0x151   : > { %v931_v37 = vmul.f32 %v923_v7, %v3064_v53  ;;  %v917_v44 = vmul.f32 0.044715, %v3080_v5  ;;  %v2065_v46 = vpop.f32.mrb[6].mxu0  ;;  %v945_v63 = vmul.f32 0.7978846, %v937_v22  ;;  %v1856_v7 = vld [vmem:[%s2634_s23 + $0x138] sm:$0xff] }
 0x152   : > { %v926_v15 = vmul.f32 %v918_v6, %v3075_v60  ;;  %v3090_v27 = vadd.f32 %v2065_v46, %v3016_v39  ;;  %v883_v28 = vpop.f32.mrb[7].mxu0  ;;  %2324 = vtanh.f32 %v946_v25  ;;  %v940_v30 = vadd.f32 %v932_v10, %v3059_v47 }
 0x153   : > { %v925_v31 = vmul.f32 %v917_v44, %v3080_v5  ;;  %v3095_v36 = vadd.f32 %v3016_v39, %v883_v28  ;;  %2326 = vtanh.f32 %v945_v63  ;;  %v939_v58 = vadd.f32 %v931_v37, %v3064_v53  ;;  %v1863_v28 = vld [vmem:[%s2634_s23 + $0x170] sm:$0xff] }
 0x154   : > { %v934_v2 = vmul.f32 %v926_v15, %v3075_v60  ;;  %v920_v56 = vmul.f32 0.044715, %v3090_v27  ;;  %v948_v42 = vmul.f32 0.7978846, %v940_v30  ;;  %v1166_v3 = vmul.f32 0.7978846, %v1158_v38 }
 0x155   : > { %v933_v50 = vmul.f32 %v925_v31, %v3080_v5  ;;  %v919_v39 = vmul.f32 0.044715, %v3095_v36  ;;  %v947_v51 = vmul.f32 0.7978846, %v939_v58  ;;  %v1159_v10 = vadd.f32 %v1151_v54, %v3020_v12 }
 0x156   : > { %v928_v55 = vmul.f32 %v920_v56, %v3090_v27  ;;  %2328 = vtanh.f32 %v948_v42  ;;  %v942_v59 = vadd.f32 %v934_v2, %v3075_v60  ;;  %v448_v6 = vmul.f32 0.25, %v3036_v14  ;;  %v1864_v14 = vld [vmem:[%s2634_s23 + $0x178] sm:$0xff] }
 0x157   : > { %v927_v19 = vmul.f32 %v919_v39, %v3095_v36  ;;  %2330 = vtanh.f32 %v947_v51  ;;  %v941_v23 = vadd.f32 %v933_v50, %v3080_v5  ;;  %v3121_v25 = vmul.f32 0.25, %v3053_v1 }
 0x158   : > { %v936_v32 = vmul.f32 %v928_v55, %v3090_v27  ;;  %2332 = vtanh.f32 %v1164_v35  ;;  %v950_v4 = vmul.f32 0.7978846, %v942_v59  ;;  %v427_v37 = vadd.f32 %v1855_v61, %v410_v33 }
 0x159   : > { %v935_v22 = vmul.f32 %v927_v19, %v3095_v36  ;;  %v949_v52 = vmul.f32 0.7978846, %v941_v23  ;;  %2334 = vtanh.f32 %v1165_v21  ;;  %v428_v46 = vadd.f32 %v1856_v7, %v3055_v45 }
 0x15a   : > { %2336 = vtanh.f32 %v950_v4  ;;  %v944_v35 = vadd.f32 %v936_v32, %v3090_v27  ;;  %v1120_v21 = vmul.f32 0.5, %v2967_v18  ;;  %v3127_v15 = vmul.f32 0.25, %v442_v57 }
 0x15b   : > { %2338 = vtanh.f32 %v949_v52  ;;  %v943_v44 = vadd.f32 %v935_v22, %v3095_v36  ;;  %v1176_v31 = vadd.f32 1.0, %v2319_v49  ;;  %v1167_v2 = vmul.f32 0.7978846, %v1159_v10 }
 0x15c   : > { %v2325_v63 = vpop.eup %2324  ;;  %2340 = vtanh.f32 %v1166_v3  ;;  %v952_v1 = vmul.f32 0.7978846, %v944_v35  ;;  %v905_v56 = vmul.f32 0.5, %v3043_v34  ;;  %v1121_v45 = vmul.f32 0.5, %v2965_v16 }
 0x15d   : > { %v2327_v30 = vpop.eup %2326  ;;  %v962_v58 = vadd.f32 1.0, %v2325_v63  ;;  %v951_v40 = vmul.f32 0.7978846, %v943_v44  ;;  %v444_v18 = vadd.f32 %v1863_v28, %v427_v37  ;;  %v445_v43 = vadd.f32 %v1864_v14, %v428_v46 }
 0x15e   : > { %v961_v42 = vadd.f32 1.0, %v2327_v30  ;;  %2342 = vtanh.f32 %v952_v1  ;;  %v1122_v39 = vmul.f32 0.5, %v2979_v26  ;;  %v1177_v51 = vadd.f32 1.0, %v3099_v62 }
 0x15f   : > { %2344 = vtanh.f32 %v951_v40  ;;  %v3137_v49 = vmul.f32 %v962_v58, %v906_v9  ;;  %v1178_v34 = vadd.f32 1.0, %v2323_v29  ;;  %v908_v55 = vmul.f32 0.5, %v3059_v47 }
 0x160   : > { %v2329_v38 = vpop.eup %2328  ;;  %v3134_v50 = vmul.f32 %v961_v42, %v905_v56  ;;  %2346 = vtanh.f32 %v1167_v2  ;;  %v1184_v16 = vmul.f32 %v1176_v31, %v1120_v21  ;;  %v907_v19 = vmul.f32 0.5, %v3064_v53 }
 0x161   : > { %v2331_v54 = vpop.eup %2330  ;;  %v964_v8 = vadd.f32 1.0, %v2329_v38  ;;  %v1123_v32 = vmul.f32 0.5, %v2969_v17  ;;  %v1179_v62 = vadd.f32 1.0, %v2321_v0  ;;  %v452_v4 = vmul.f32 0.25, %v444_v18 }
 0x162   : > { %v2333_v57 = vpop.eup %2332  ;;  %v1192_v59 = vadd.f32 %v3134_v50, %v3028_v11  ;;  %v963_v23 = vadd.f32 1.0, %v2331_v54  ;;  %v1193_v7 = vadd.f32 %v3137_v49, %v3025_v20  ;;  %v1124_v11 = vmul.f32 0.5, %v2989_v41 }
 0x163   : > { %v2335_v33 = vpop.eup %2334  ;;  %v3144_v26 = vmul.f32 %v964_v8, %v908_v55  ;;  %v1186_v53 = vmul.f32 %v1178_v34, %v1122_v39  ;;  %v1185_v52 = vmul.f32 %v1177_v51, %v1121_v45  ;;  %v1180_v10 = vadd.f32 1.0, %v2333_v57  ;;  %v1323_v8 = vld [vmem:[%s3406_s1 + $0x148] sm:$0xff]  ;;  %v1324_v57 = vld [vmem:[%s3406_s1 + $0x150] sm:$0xff] }
 0x164   : > { %v2337_v61 = vpop.eup %2336  ;;  %v3147_v3 = vadd.f32 %v1192_v59, %v1184_v16  ;;  %v3149_v47 = vmul.f32 %v963_v23, %v907_v19  ;;  %v909_v0 = vmul.f32 0.5, %v3080_v5  ;;  %v910_v44 = vmul.f32 0.5, %v3075_v60  ;;  %v1325_v59 = vld [vmem:[%s3406_s1 + $0x158] sm:$0xff] }
 0x165   : > { %v2339_v22 = vpop.eup %2338  ;;  %v966_v35 = vadd.f32 1.0, %v2337_v61  ;;  %v1187_v46 = vmul.f32 %v1179_v62, %v1123_v32  ;;  %v1195_v20 = vadd.f32 %v3144_v26, %v3030_v24  ;;  %v1125_v41 = vmul.f32 0.5, %v2984_v48 }
 0x166   : > { %v2341_v29 = vpop.eup %2340  ;;  %1208 = vadd.xlane.f32.xlu0 %v3147_v3  ;;  %v1194_v17 = vadd.f32 %v3149_v47, %v448_v6  ;;  %v965_v37 = vadd.f32 1.0, %v2339_v22  ;;  %v1126_v63 = vmul.f32 0.5, %v3022_v13  ;;  %v1201_v14 = vadd.f32 %v1193_v7, %v1185_v52 }
 0x167   : > { %v3164_v30 = vmul.f32 %v966_v35, %v910_v44  ;;  %v1188_v5 = vmul.f32 %v1180_v10, %v1124_v11  ;;  %v1181_v31 = vadd.f32 1.0, %v2335_v33  ;;  %v1182_v58 = vadd.f32 1.0, %v2341_v29 }
 0x168   : > { %v2343_v21 = vpop.eup %2342  ;;  %v1202_v28 = vadd.f32 %v1194_v17, %v1186_v53  ;;  %v3162_v1 = vmul.f32 %v965_v37, %v909_v0  ;;  %v911_v48 = vmul.f32 0.5, %v3095_v36  ;;  %v912_v40 = vmul.f32 0.5, %v3090_v27 }
 0x169   : > { %v2345_v6 = vpop.eup %2344  ;;  %v968_v60 = vadd.f32 1.0, %v2343_v21  ;;  %v1203_v56 = vadd.f32 %v1195_v20, %v1187_v46  ;;  %v453_v42 = vmul.f32 0.25, %v445_v43  ;;  %v1197_v45 = vadd.f32 %v3164_v30, %v3121_v25 }
 0x16a   : > { %1212 = vadd.xlane.f32.xlu1 %v1202_v28  ;;  %1210 = vadd.xlane.f32.xlu0 %v1201_v14  ;;  %v1196_v24 = vadd.f32 %v3162_v1, %v3127_v15  ;;  %v967_v13 = vadd.f32 1.0, %v2345_v6  ;;  %v2347_v2 = vpop.eup %2346  ;;  %v1127_v39 = vmul.f32 0.5, %v3020_v12  ;;  %v1189_v15 = vmul.f32 %v1181_v31, %v1125_v41  ;;  %v1322_v12 = vld [vmem:[%s3406_s1 + $0x140] sm:$0xff] }
 0x16b   : > { %v3174_v38 = vmul.f32 %v968_v60, %v912_v40  ;;  %v1190_v36 = vmul.f32 %v1182_v58, %v1126_v63  ;;  %v1183_v27 = vadd.f32 1.0, %v2347_v2  ;;  %v2218_v16 = vpack.c.bf16 %v1323_v8, %v1322_v12  ;;  %v1328_v2 = vld [vmem:[%s3406_s1 + $0x170] sm:$0xff] }
 0x16c   : > { %v1204_v9 = vadd.f32 %v1196_v24, %v1188_v5  ;;  %v3172_v18 = vmul.f32 %v967_v13, %v911_v48  ;;  %v1205_v54 = vadd.f32 %v1197_v45, %v1189_v15  ;;  %v2222_v19 = vpack.c.bf16 %v1325_v59, %v1324_v57  ;;  %v1326_v24 = vld [vmem:[%s3406_s1 + $0x160] sm:$0xff]  ;;  %v1327_v48 = vld [vmem:[%s3406_s1 + $0x168] sm:$0xff]  ;;  %v1332_v15 = vld [vmem:[%s3406_s1 + $0x190] sm:$0xff] }
 0x16d   : > { %v1199_v43 = vadd.f32 %v3174_v38, %v453_v42  ;;  %v1191_v25 = vmul.f32 %v1183_v27, %v1127_v39  ;;  %2219 = vmatprep.subr.bf16.mxu1 %v2218_v16  ;;  %v2226_v13 = vpack.c.bf16 %v1327_v48, %v1326_v24  ;;  %v1331_v45 = vld [vmem:[%s3406_s1 + $0x188] sm:$0xff]  ;;  %v1334_v27 = vld [vmem:[%s3406_s1 + $0x1a0] sm:$0xff] }
 0x16e   : > { %1214 = vadd.xlane.f32.xlu1 %v1203_v56  ;;  %1216 = vadd.xlane.f32.xlu0 %v1204_v9  ;;  %v1198_v51 = vadd.f32 %v3172_v18, %v452_v4 }
 0x16f   : > { %v1207_v55 = vadd.f32 %v1199_v43, %v1191_v25  ;;  %2221 = vmatpush3.bf16.msra.mxu1 %v2218_v16  ;;  %v1336_v43 = vld [vmem:[%s3406_s1 + $0x1b0] sm:$0xff]  ;;  %v1337_v25 = vld [vmem:[%s3406_s1 + $0x1b8] sm:$0xff] }
 0x170   : > { %v1206_v34 = vadd.f32 %v1198_v51, %v1190_v36  ;;  %2223 = vmatprep.subr.bf16.mxu1 %v2222_v19  ;;  %v1333_v36 = vld [vmem:[%s3406_s1 + $0x198] sm:$0xff] }
 0x171   : > { %v2238_v51 = vpack.c.bf16 %v1333_v36, %v1332_v15 }
 0x172   : > { %1218 = vadd.xlane.f32.xlu1 %v1205_v54  ;;  %1220 = vadd.xlane.f32.xlu0 %v1206_v34 }
 0x173   : > { %2225 = vmatpush3.bf16.msra.mxu1 %v2222_v19 }
 0x174   : > { %2227 = vmatprep.subr.bf16.mxu1 %v2226_v13 }
 0x176   : > { %1222 = vadd.xlane.f32.xlu1 %v1207_v55 }
 0x177   : > { %2229 = vmatpush3.bf16.msra.mxu1 %v2226_v13 }
 0x1f3   : > { %v1209_v23 = vpop.xlane.xlu0 %1208 }
 0x1f4   : > { %v1224_v33 = vmul.f32 0.0078125, %v1209_v23 }
 0x1f6   : > { %v3192_v32 = vsub.f32 %v3147_v3, %v1224_v33 }
 0x1f7   : > { %v1213_v62 = vpop.xlane.xlu1 %1212  ;;  %v1211_v4 = vpop.xlane.xlu0 %1210 }
 0x1f8   : > { %v1226_v61 = vmul.f32 0.0078125, %v1213_v62  ;;  %v1225_v7 = vmul.f32 0.0078125, %v1211_v4  ;;  %v1240_v11 = vmul.f32 %v3192_v32, %v3192_v32 }
 0x1fa   : > { %v3196_v22 = vsub.f32 %v1202_v28, %v1226_v61  ;;  %v3198_v53 = vsub.f32 %v1201_v14, %v1225_v7  ;;  %1248 = vadd.xlane.f32.xlu0 %v1240_v11 }
 0x1fb   : > { %v1215_v52 = vpop.xlane.xlu1 %1214  ;;  %v1217_v10 = vpop.xlane.xlu0 %1216 }
 0x1fc   : > { %v1227_v35 = vmul.f32 0.0078125, %v1215_v52  ;;  %v1228_v29 = vmul.f32 0.0078125, %v1217_v10  ;;  %v1242_v3 = vmul.f32 %v3196_v22, %v3196_v22  ;;  %v1241_v17 = vmul.f32 %v3198_v53, %v3198_v53 }
 0x1fe   : > { %v3204_v0 = vsub.f32 %v1203_v56, %v1227_v35  ;;  %v3206_v37 = vsub.f32 %v1204_v9, %v1228_v29  ;;  %1252 = vadd.xlane.f32.xlu0 %v1242_v3  ;;  %1250 = vadd.xlane.f32.xlu1 %v1241_v17  ;;  %v1329_v56 = vld [vmem:[%s3406_s1 + $0x178] sm:$0xff]  ;;  %v1330_v9 = vld [vmem:[%s3406_s1 + $0x180] sm:$0xff] }
 0x1ff   : > { %v1219_v44 = vpop.xlane.xlu1 %1218  ;;  %v1221_v46 = vpop.xlane.xlu0 %1220  ;;  %v2230_v42 = vpack.c.bf16 %v1329_v56, %v1328_v2  ;;  %v2234_v39 = vpack.c.bf16 %v1331_v45, %v1330_v9 }
 0x200   : > { %v1229_v20 = vmul.f32 0.0078125, %v1219_v44  ;;  %v1230_v41 = vmul.f32 0.0078125, %v1221_v46  ;;  %v1243_v63 = vmul.f32 %v3204_v0, %v3204_v0  ;;  %v1244_v21 = vmul.f32 %v3206_v37, %v3206_v37 }
 0x201   : > { %2231 = vmatprep.subr.bf16.mxu1 %v2230_v42 }
 0x202   : > { %v3212_v28 = vsub.f32 %v1205_v54, %v1229_v20  ;;  %v3214_v14 = vsub.f32 %v1206_v34, %v1230_v41  ;;  %1254 = vadd.xlane.f32.xlu1 %v1243_v63  ;;  %1256 = vadd.xlane.f32.xlu0 %v1244_v21  ;;  %v1335_v54 = vld [vmem:[%s3406_s1 + $0x1a8] sm:$0xff]  ;;  %v1879_v41 = vld [vmem:[%s3406_s1 + $0x1c6] ss:$0 sm:$0xff] }
 0x203   : > { %v1223_v6 = vpop.xlane.xlu1 %1222  ;;  %2233 = vmatpush3.bf16.msra.mxu1 %v2230_v42  ;;  %v2242_v34 = vpack.c.bf16 %v1335_v54, %v1334_v27 }
 0x204   : > { %v1231_v5 = vmul.f32 0.0078125, %v1223_v6  ;;  %v1245_v31 = vmul.f32 %v3212_v28, %v3212_v28  ;;  %v1246_v58 = vmul.f32 %v3214_v14, %v3214_v14  ;;  %2235 = vmatprep.subr.bf16.mxu1 %v2234_v39 }
 0x206   : > { %v3220_v60 = vsub.f32 %v1207_v55, %v1231_v5  ;;  %1258 = vadd.xlane.f32.xlu1 %v1245_v31  ;;  %1260 = vadd.xlane.f32.xlu0 %v1246_v58  ;;  %v2246_v55 = vpack.c.bf16 %v1337_v25, %v1336_v43  ;;  %v1880_v5 = vld [vmem:[%s3406_s1 + $0x1c7] ss:$0 sm:$0xff] }
 0x207   : > { %2237 = vmatpush3.bf16.msra.mxu1 %v2234_v39 }
 0x208   : > { %v1247_v40 = vmul.f32 %v3220_v60, %v3220_v60  ;;  %2239 = vmatprep.subr.bf16.mxu1 %v2238_v51 }
 0x20a   : > { %1262 = vadd.xlane.f32.xlu1 %v1247_v40 }
 0x20b   : > { %2241 = vmatpush3.bf16.msra.mxu1 %v2238_v51 }
 0x20c   : > { %2243 = vmatprep.subr.bf16.mxu1 %v2242_v34 }
 0x20f   : > { %2245 = vmatpush3.bf16.msra.mxu1 %v2242_v34 }
 0x210   : > { %2247 = vmatprep.subr.bf16.mxu1 %v2246_v55 }
 0x213   : > { %2249 = vmatpush3.bf16.msra.mxu1 %v2246_v55 }
 0x287   : > { %v1249_v12 = vpop.xlane.xlu0 %1248 }
 0x288   : > { %v1264_v8 = vmul.f32 0.0078125, %v1249_v12 }
 0x28a   : > { %v1272_v57 = vadd.f32 1e-05, %v1264_v8 }
 0x28b   : > { %v1251_v16 = vpop.xlane.xlu1 %1250  ;;  %v1253_v59 = vpop.xlane.xlu0 %1252 }
 0x28c   : > { %2348 = vrsqrt.f32 %v1272_v57  ;;  %v1265_v19 = vmul.f32 0.0078125, %v1251_v16  ;;  %v1266_v23 = vmul.f32 0.0078125, %v1253_v59 }
 0x28e   : > { %v1273_v33 = vadd.f32 1e-05, %v1265_v19  ;;  %v1274_v62 = vadd.f32 1e-05, %v1266_v23 }
 0x28f   : > { %v1255_v4 = vpop.xlane.xlu1 %1254  ;;  %v1257_v61 = vpop.xlane.xlu0 %1256 }
 0x290   : > { %2350 = vrsqrt.f32 %v1273_v33  ;;  %v1267_v7 = vmul.f32 0.0078125, %v1255_v4  ;;  %v1268_v11 = vmul.f32 0.0078125, %v1257_v61 }
 0x291   : > { %2352 = vrsqrt.f32 %v1274_v62 }
 0x292   : > { %v1275_v52 = vadd.f32 1e-05, %v1267_v7  ;;  %v1276_v10 = vadd.f32 1e-05, %v1268_v11 }
 0x293   : > { %v1259_v35 = vpop.xlane.xlu1 %1258  ;;  %v1261_v29 = vpop.xlane.xlu0 %1260 }
 0x294   : > { %2354 = vrsqrt.f32 %v1275_v52  ;;  %v1269_v3 = vmul.f32 0.0078125, %v1259_v35  ;;  %v1270_v17 = vmul.f32 0.0078125, %v1261_v29 }
 0x295   : > { %2356 = vrsqrt.f32 %v1276_v10 }
 0x296   : > { %v2349_v44 = vpop.eup %2348  ;;  %v1277_v46 = vadd.f32 1e-05, %v1269_v3  ;;  %v1278_v20 = vadd.f32 1e-05, %v1270_v17 }
 0x297   : > { %v1263_v63 = vpop.xlane.xlu1 %1262  ;;  %v1288_v21 = vmul.f32 %v2349_v44, %v3192_v32 }
 0x298   : > { %2358 = vrsqrt.f32 %v1277_v46  ;;  %v1271_v6 = vmul.f32 0.0078125, %v1263_v63 }
 0x299   : > { %2360 = vrsqrt.f32 %v1278_v20  ;;  %v1301_v31 = vmul.f32 %v1879_v41, %v1288_v21 }
 0x29a   : > { %v2351_v58 = vpop.eup %2350  ;;  %v1279_v24 = vadd.f32 1e-05, %v1271_v6 }
 0x29b   : > { %v2353_v48 = vpop.eup %2352  ;;  %v1289_v13 = vmul.f32 %v2351_v58, %v3198_v53  ;;  %v1314_v40 = vadd.f32 %v1880_v5, %v1301_v31 }
 0x29c   : > { %2362 = vrsqrt.f32 %v1279_v24  ;;  %v1290_v2 = vmul.f32 %v2353_v48, %v3196_v22 }
 0x29d   : > { %2126 = vmatprep.mubr.f32.mxu1 %v1314_v40  ;;  %v1302_v56 = vmul.f32 %v1879_v41, %v1289_v13 }
 0x29e   : > { %v2355_v32 = vpop.eup %2354  ;;  %v1303_v42 = vmul.f32 %v1879_v41, %v1290_v2 }
 0x29f   : > { %v2357_v9 = vpop.eup %2356  ;;  %v1315_v45 = vadd.f32 %v1880_v5, %v1302_v56  ;;  %v1291_v39 = vmul.f32 %v2355_v32, %v3204_v0 }
 0x2a0   : > { %v1316_v15 = vadd.f32 %v1880_v5, %v1303_v42  ;;  %v1292_v36 = vmul.f32 %v2357_v9, %v3206_v37 }
 0x2a1   : > { %2127 = vmatmul.mubr.f32.vlgmr.msra.gmra.mrb[8].mxu1 %v1315_v45  ;;  %v1304_v51 = vmul.f32 %v1879_v41, %v1291_v39 }
 0x2a2   : > { %v2359_v27 = vpop.eup %2358  ;;  %2129 = vmatprep.mubr.f32.mxu1 %v1316_v15  ;;  %v1305_v53 = vmul.f32 %v1879_v41, %v1292_v36 }
 0x2a3   : > { %v2361_v54 = vpop.eup %2360  ;;  %v1317_v34 = vadd.f32 %v1880_v5, %v1304_v51  ;;  %v1293_v22 = vmul.f32 %v2359_v27, %v3212_v28  ;;  %v1881_v28 = vld [vmem:[%s3406_s1 + $0x1c8] ss:$0 sm:$0xff] }
 0x2a4   : > { %v1318_v43 = vadd.f32 %v1880_v5, %v1305_v53  ;;  %v1294_v25 = vmul.f32 %v2361_v54, %v3214_v14 }
 0x2a5   : > { %2130 = vmatmul.mubr.f32.gmra.mrb[10].mxu1 %v1317_v34  ;;  %v1306_v55 = vmul.f32 %v1879_v41, %v1293_v22 }
 0x2a6   : > { %v2363_v12 = vpop.eup %2362  ;;  %2132 = vmatprep.mubr.f32.mxu1 %v1318_v43  ;;  %v1307_v0 = vmul.f32 %v1879_v41, %v1294_v25 }
 0x2a7   : > { %v1319_v8 = vadd.f32 %v1880_v5, %v1306_v55  ;;  %v1295_v37 = vmul.f32 %v2363_v12, %v3220_v60 }
 0x2a8   : > { %v1320_v57 = vadd.f32 %v1880_v5, %v1307_v0 }
 0x2a9   : > { %2133 = vmatmul.mubr.f32.gmra.mrb[12].mxu1 %v1319_v8  ;;  %v1308_v16 = vmul.f32 %v1879_v41, %v1295_v37 }
 0x2aa   : > { %2135 = vmatprep.mubr.f32.mxu1 %v1320_v57 }
 0x2ab   : > { %v1321_v59 = vadd.f32 %v1880_v5, %v1308_v16 }
 0x2ad   : > { %2136 = vmatmul.mubr.f32.gmra.mrb[14].mxu1 %v1321_v59 }
 0x374   : > { %v2128_v19 = vpop.f32.mrb[8].mxu1 }
 0x375   : > { %v1415_v14 = vadd.f32 %v2128_v19, %v1881_v28  ;;  %v1409_v23 = vpop.f32.mrb[9].mxu1 }
 0x376   : > { %v1410_v33 = vadd.f32 %v1881_v28, %v1409_v23 }
 0x377   : > { %v1457_v62 = vmul.f32 0.044715, %v1415_v14  ;;  %v1449_v23 = vmul.f32 0.5, %v1415_v14 }
 0x378   : > { %v1456_v4 = vmul.f32 0.044715, %v1410_v33  ;;  %v2131_v61 = vpop.f32.mrb[10].mxu1 }
 0x379   : > { %v1465_v7 = vmul.f32 %v1457_v62, %v1415_v14  ;;  %v3277_v11 = vadd.f32 %v2131_v61, %v1881_v28  ;;  %v1419_v60 = vpop.f32.mrb[11].mxu1  ;;  %v1448_v61 = vmul.f32 0.5, %v1410_v33 }
 0x37a   : > { %v1464_v52 = vmul.f32 %v1456_v4, %v1410_v33  ;;  %v3279_v10 = vadd.f32 %v1881_v28, %v1419_v60 }
 0x37b   : > { %v1459_v35 = vmul.f32 0.044715, %v3277_v11  ;;  %v1473_v29 = vmul.f32 %v1465_v7, %v1415_v14 }
 0x37c   : > { %v1458_v3 = vmul.f32 0.044715, %v3279_v10  ;;  %v2134_v17 = vpop.f32.mrb[12].mxu1  ;;  %v1472_v44 = vmul.f32 %v1464_v52, %v1410_v33 }
 0x37d   : > { %v1467_v46 = vmul.f32 %v1459_v35, %v3277_v11  ;;  %v3284_v20 = vadd.f32 %v2134_v17, %v1881_v28  ;;  %v1429_v41 = vpop.f32.mrb[13].mxu1  ;;  %v1481_v63 = vadd.f32 %v1473_v29, %v1415_v14  ;;  %v1451_v17 = vmul.f32 0.5, %v3277_v11 }
 0x37e   : > { %v1466_v21 = vmul.f32 %v1458_v3, %v3279_v10  ;;  %v3287_v6 = vadd.f32 %v1881_v28, %v1429_v41  ;;  %v1480_v5 = vadd.f32 %v1472_v44, %v1410_v33  ;;  %v1450_v41 = vmul.f32 0.5, %v3279_v10 }
 0x37f   : > { %v1461_v31 = vmul.f32 0.044715, %v3284_v20  ;;  %v1489_v58 = vmul.f32 0.7978846, %v1481_v63  ;;  %v1475_v24 = vmul.f32 %v1467_v46, %v3277_v11 }
 0x380   : > { %v1460_v48 = vmul.f32 0.044715, %v3287_v6  ;;  %v2137_v13 = vpop.f32.mrb[14].mxu1  ;;  %v1488_v40 = vmul.f32 0.7978846, %v1480_v5  ;;  %v1474_v2 = vmul.f32 %v1466_v21, %v3279_v10 }
 0x381   : > { %v1469_v56 = vmul.f32 %v1461_v31, %v3284_v20  ;;  %v3294_v32 = vadd.f32 %v2137_v13, %v1881_v28  ;;  %v1439_v42 = vpop.f32.mrb[15].mxu1  ;;  %2364 = vtanh.f32 %v1489_v58  ;;  %v1483_v9 = vadd.f32 %v1475_v24, %v3277_v11 }
 0x382   : > { %v1468_v45 = vmul.f32 %v1460_v48, %v3287_v6  ;;  %v3298_v39 = vadd.f32 %v1881_v28, %v1439_v42  ;;  %2366 = vtanh.f32 %v1488_v40  ;;  %v1482_v15 = vadd.f32 %v1474_v2, %v3279_v10 }
 0x383   : > { %v1463_v36 = vmul.f32 0.044715, %v3294_v32  ;;  %v1491_v51 = vmul.f32 0.7978846, %v1483_v9  ;;  %v1477_v27 = vmul.f32 %v1469_v56, %v3284_v20  ;;  %v1453_v58 = vmul.f32 0.5, %v3284_v20 }
 0x384   : > { %v1462_v53 = vmul.f32 0.044715, %v3298_v39  ;;  %v1490_v54 = vmul.f32 0.7978846, %v1482_v15  ;;  %v1476_v34 = vmul.f32 %v1468_v45, %v3287_v6  ;;  %v1452_v11 = vmul.f32 0.5, %v3287_v6 }
 0x385   : > { %v1471_v22 = vmul.f32 %v1463_v36, %v3294_v32  ;;  %2368 = vtanh.f32 %v1491_v51  ;;  %v1485_v43 = vadd.f32 %v1477_v27, %v3284_v20  ;;  %v1455_v56 = vmul.f32 0.5, %v3294_v32 }
 0x386   : > { %v1470_v25 = vmul.f32 %v1462_v53, %v3298_v39  ;;  %2370 = vtanh.f32 %v1490_v54  ;;  %v1484_v55 = vadd.f32 %v1476_v34, %v3287_v6  ;;  %v1454_v20 = vmul.f32 0.5, %v3298_v39 }
 0x387   : > { %v1493_v12 = vmul.f32 0.7978846, %v1485_v43  ;;  %v1479_v0 = vmul.f32 %v1471_v22, %v3294_v32 }
 0x388   : > { %v1492_v8 = vmul.f32 0.7978846, %v1484_v55  ;;  %v1478_v37 = vmul.f32 %v1470_v25, %v3298_v39 }
 0x389   : > { %2372 = vtanh.f32 %v1493_v12  ;;  %v1487_v57 = vadd.f32 %v1479_v0, %v3294_v32 }
 0x38a   : > { %2374 = vtanh.f32 %v1492_v8  ;;  %v1486_v16 = vadd.f32 %v1478_v37, %v3298_v39 }
 0x38b   : > { %v2365_v59 = vpop.eup %2364  ;;  %v1495_v28 = vmul.f32 0.7978846, %v1487_v57 }
 0x38c   : > { %v2367_v19 = vpop.eup %2366  ;;  %v1505_v62 = vadd.f32 1.0, %v2365_v59  ;;  %v1494_v4 = vmul.f32 0.7978846, %v1486_v16 }
 0x38d   : > { %v1504_v7 = vadd.f32 1.0, %v2367_v19  ;;  %2376 = vtanh.f32 %v1495_v28 }
 0x38e   : > { %v1513_v60 = vmul.f32 %v1505_v62, %v1449_v23  ;;  %2378 = vtanh.f32 %v1494_v4 }
 0x38f   : > { %v2369_v52 = vpop.eup %2368  ;;  %v1512_v35 = vmul.f32 %v1504_v7, %v1448_v61 }
 0x390   : > { %v2371_v29 = vpop.eup %2370  ;;  %v1521_v3 = vadd.f32 %v1513_v60, %v3137_v49  ;;  %v1507_v44 = vadd.f32 1.0, %v2369_v52 }
 0x391   : > { %v1520_v46 = vadd.f32 %v1512_v35, %v3134_v50  ;;  %v1506_v14 = vadd.f32 1.0, %v2371_v29 }
 0x392   : > { %1530 = vadd.xlane.f32.xlu1 %v1521_v3  ;;  %v1515_v63 = vmul.f32 %v1507_v44, %v1451_v17 }
 0x393   : > { %v2373_v33 = vpop.eup %2372  ;;  %1528 = vadd.xlane.f32.xlu0 %v1520_v46  ;;  %v1514_v21 = vmul.f32 %v1506_v14, %v1450_v41 }
 0x394   : > { %v2375_v5 = vpop.eup %2374  ;;  %v1523_v31 = vadd.f32 %v1515_v63, %v3144_v26  ;;  %v1509_v24 = vadd.f32 1.0, %v2373_v33 }
 0x395   : > { %v1522_v49 = vadd.f32 %v1514_v21, %v3149_v47  ;;  %v1508_v48 = vadd.f32 1.0, %v2375_v5 }
 0x396   : > { %1534 = vadd.xlane.f32.xlu1 %v1523_v31  ;;  %v1517_v50 = vmul.f32 %v1509_v24, %v1453_v58 }
 0x397   : > { %v2377_v10 = vpop.eup %2376  ;;  %1532 = vadd.xlane.f32.xlu0 %v1522_v49  ;;  %v1516_v13 = vmul.f32 %v1508_v48, %v1452_v11 }
 0x398   : > { %v2379_v40 = vpop.eup %2378  ;;  %v1525_v2 = vadd.f32 %v1517_v50, %v3164_v30  ;;  %v1511_v42 = vadd.f32 1.0, %v2377_v10 }
 0x399   : > { %v1524_v26 = vadd.f32 %v1516_v13, %v3162_v1  ;;  %v1510_v9 = vadd.f32 1.0, %v2379_v40  ;;  %v1882_v1 = vld [vmem:[%s3406_s1 + $0x1cd] ss:$0 sm:$0xff] }
 0x39a   : > { %1538 = vadd.xlane.f32.xlu1 %v1525_v2  ;;  %v1519_v47 = vmul.f32 %v1511_v42, %v1455_v56 }
 0x39b   : > { %1536 = vadd.xlane.f32.xlu0 %v1524_v26  ;;  %v1518_v6 = vmul.f32 %v1510_v9, %v1454_v20 }
 0x39c   : > { %v1527_v45 = vadd.f32 %v1519_v47, %v3174_v38 }
 0x39d   : > { %v1526_v15 = vadd.f32 %v1518_v6, %v3172_v18 }
 0x39e   : > { %1542 = vadd.xlane.f32.xlu1 %v1527_v45 }
 0x39f   : > { %1540 = vadd.xlane.f32.xlu0 %v1526_v15 }
 0x41f   : > { %v1531_v36 = vpop.xlane.xlu1 %1530 }
 0x420   : > { %v1545_v30 = vmul.f32 0.015625, %v1531_v36  ;;  %v1529_v51 = vpop.xlane.xlu0 %1528 }
 0x421   : > { %v1544_v32 = vmul.f32 0.015625, %v1529_v51 }
 0x422   : > { %v1553_v39 = vsub.f32 %v1521_v3, %v1545_v30  ;;  %v1883_v30 = vld [vmem:[%s3406_s1 + $0x1c9] ss:$0 sm:$0xff] }
 0x423   : > { %v1552_v27 = vsub.f32 %v1520_v46, %v1544_v32  ;;  %v1535_v53 = vpop.xlane.xlu1 %1534 }
 0x424   : > { %v1547_v54 = vmul.f32 0.015625, %v1535_v53  ;;  %v1533_v34 = vpop.xlane.xlu0 %1532  ;;  %v3330_v22 = vmul.f32 %v1882_v1, %v1553_v39  ;;  %v1884_v39 = vld [vmem:[%s3406_s1 + $0x1ca] ss:$0 sm:$0xff] }
 0x425   : > { %v1546_v38 = vmul.f32 0.015625, %v1533_v34  ;;  %v3332_v43 = vmul.f32 %v1882_v1, %v1552_v27  ;;  %v1885_v34 = vld [vmem:[%s3406_s1 + $0x1cb] ss:$0 sm:$0xff] }
 0x426   : > { %v1555_v18 = vsub.f32 %v1523_v31, %v1547_v54  ;;  %v1574_v25 = vmul.f32 %v3330_v22, %v3330_v22 }
 0x427   : > { %v1554_v55 = vsub.f32 %v1522_v49, %v1546_v38  ;;  %v1539_v12 = vpop.xlane.xlu1 %1538  ;;  %v1573_v0 = vmul.f32 %v3332_v43, %v3332_v43 }
 0x428   : > { %v1549_v8 = vmul.f32 0.015625, %v1539_v12  ;;  %1583 = vadd.xlane.f32.xlu1 %v1574_v25  ;;  %v1537_v37 = vpop.xlane.xlu0 %1536  ;;  %v3338_v57 = vmul.f32 %v1882_v1, %v1555_v18 }
 0x429   : > { %v1548_v16 = vmul.f32 0.015625, %v1537_v37  ;;  %1581 = vadd.xlane.f32.xlu0 %v1573_v0  ;;  %v3340_v59 = vmul.f32 %v1882_v1, %v1554_v55 }
 0x42a   : > { %v1557_v28 = vsub.f32 %v1525_v2, %v1549_v8  ;;  %v1576_v19 = vmul.f32 %v3338_v57, %v3338_v57 }
 0x42b   : > { %v1556_v23 = vsub.f32 %v1524_v26, %v1548_v16  ;;  %v1543_v62 = vpop.xlane.xlu1 %1542  ;;  %v1575_v4 = vmul.f32 %v3340_v59, %v3340_v59 }
 0x42c   : > { %v1551_v61 = vmul.f32 0.015625, %v1543_v62  ;;  %1587 = vadd.xlane.f32.xlu1 %v1576_v19  ;;  %v1541_v7 = vpop.xlane.xlu0 %1540  ;;  %v3346_v60 = vmul.f32 %v1882_v1, %v1557_v28 }
 0x42d   : > { %v1550_v52 = vmul.f32 0.015625, %v1541_v7  ;;  %1585 = vadd.xlane.f32.xlu0 %v1575_v4  ;;  %v3348_v35 = vmul.f32 %v1882_v1, %v1556_v23 }
 0x42e   : > { %v1559_v29 = vsub.f32 %v1527_v45, %v1551_v61  ;;  %v1578_v3 = vmul.f32 %v3346_v60, %v3346_v60 }
 0x42f   : > { %v1558_v17 = vsub.f32 %v1526_v15, %v1550_v52  ;;  %v1577_v44 = vmul.f32 %v3348_v35, %v3348_v35 }
 0x430   : > { %1591 = vadd.xlane.f32.xlu1 %v1578_v3  ;;  %v3354_v46 = vmul.f32 %v1882_v1, %v1559_v29 }
 0x431   : > { %1589 = vadd.xlane.f32.xlu0 %v1577_v44  ;;  %v3356_v41 = vmul.f32 %v1882_v1, %v1558_v17 }
 0x432   : > { %v1580_v14 = vmul.f32 %v3354_v46, %v3354_v46 }
 0x433   : > { %v1579_v63 = vmul.f32 %v3356_v41, %v3356_v41 }
 0x434   : > { %1595 = vadd.xlane.f32.xlu1 %v1580_v14 }
 0x435   : > { %1593 = vadd.xlane.f32.xlu0 %v1579_v63 }
 0x4b5   : > { %v1584_v33 = vpop.xlane.xlu1 %1583 }
 0x4b6   : > { %v1598_v21 = vmul.f32 0.015625, %v1584_v33  ;;  %v1582_v5 = vpop.xlane.xlu0 %1581 }
 0x4b7   : > { %v1597_v31 = vmul.f32 0.015625, %v1582_v5 }
 0x4b8   : > { %v1606_v58 = vadd.f32 1e-05, %v1598_v21 }
 0x4b9   : > { %v1605_v24 = vadd.f32 1e-05, %v1597_v31  ;;  %v1588_v49 = vpop.xlane.xlu1 %1587 }
 0x4ba   : > { %2380 = vrsqrt.f32 %v1606_v58  ;;  %v1600_v11 = vmul.f32 0.015625, %v1588_v49  ;;  %v1586_v48 = vpop.xlane.xlu0 %1585 }
 0x4bb   : > { %2382 = vrsqrt.f32 %v1605_v24  ;;  %v1599_v50 = vmul.f32 0.015625, %v1586_v48 }
 0x4bc   : > { %v1608_v10 = vadd.f32 1e-05, %v1600_v11 }
 0x4bd   : > { %v1607_v13 = vadd.f32 1e-05, %v1599_v50  ;;  %v1592_v40 = vpop.xlane.xlu1 %1591 }
 0x4be   : > { %2384 = vrsqrt.f32 %v1608_v10  ;;  %v1602_v2 = vmul.f32 0.015625, %v1592_v40  ;;  %v1590_v56 = vpop.xlane.xlu0 %1589 }
 0x4bf   : > { %2386 = vrsqrt.f32 %v1607_v13  ;;  %v1601_v42 = vmul.f32 0.015625, %v1590_v56 }
 0x4c0   : > { %v1610_v26 = vadd.f32 1e-05, %v1602_v2 }
 0x4c1   : > { %v1609_v20 = vadd.f32 1e-05, %v1601_v42  ;;  %v1596_v9 = vpop.xlane.xlu1 %1595 }
 0x4c2   : > { %2388 = vrsqrt.f32 %v1610_v26  ;;  %v1604_v47 = vmul.f32 0.015625, %v1596_v9  ;;  %v1594_v6 = vpop.xlane.xlu0 %1593 }
 0x4c3   : > { %2390 = vrsqrt.f32 %v1609_v20  ;;  %v1603_v45 = vmul.f32 0.015625, %v1594_v6 }
 0x4c4   : > { %v2381_v15 = vpop.eup %2380  ;;  %v1612_v36 = vadd.f32 1e-05, %v1604_v47 }
 0x4c5   : > { %v2383_v51 = vpop.eup %2382  ;;  %v1611_v32 = vadd.f32 1e-05, %v1603_v45  ;;  %v1622_v1 = vmul.f32 %v2381_v15, %v3330_v22 }
 0x4c6   : > { %2392 = vrsqrt.f32 %v1612_v36  ;;  %v1621_v27 = vmul.f32 %v2383_v51, %v3332_v43 }
 0x4c7   : > { %2394 = vrsqrt.f32 %v1611_v32  ;;  %v1635_v53 = vmul.f32 %v1883_v30, %v1622_v1 }
 0x4c8   : > { %v2385_v54 = vpop.eup %2384  ;;  %v1634_v38 = vmul.f32 %v1883_v30, %v1621_v27 }
 0x4c9   : > { %v2387_v18 = vpop.eup %2386  ;;  %v1648_v25 = vadd.f32 %v1884_v39, %v1635_v53  ;;  %v1624_v55 = vmul.f32 %v2385_v54, %v3338_v57 }
 0x4ca   : > { %v1647_v22 = vadd.f32 %v1884_v39, %v1634_v38  ;;  %v1623_v12 = vmul.f32 %v2387_v18, %v3340_v59 }
 0x4cb   : > { %v1661_v0 = vmul.f32 %v1885_v34, %v1648_v25  ;;  %v1637_v8 = vmul.f32 %v1883_v30, %v1624_v55 }
 0x4cc   : > { %v2389_v37 = vpop.eup %2388  ;;  %v1660_v16 = vmul.f32 %v1885_v34, %v1647_v22  ;;  %v1636_v43 = vmul.f32 %v1883_v30, %v1623_v12 }
 0x4cd   : > { %v2391_v28 = vpop.eup %2390  ;;  %1670 = vadd.xlane.f32.xlu1 %v1661_v0  ;;  %v1650_v19 = vadd.f32 %v1884_v39, %v1637_v8  ;;  %v1626_v23 = vmul.f32 %v2389_v37, %v3346_v60 }
 0x4ce   : > { %1668 = vadd.xlane.f32.xlu0 %v1660_v16  ;;  %v1649_v62 = vadd.f32 %v1884_v39, %v1636_v43  ;;  %v1625_v4 = vmul.f32 %v2391_v28, %v3348_v35 }
 0x4cf   : > { %v1663_v61 = vmul.f32 %v1885_v34, %v1650_v19  ;;  %v1639_v7 = vmul.f32 %v1883_v30, %v1626_v23 }
 0x4d0   : > { %v2393_v57 = vpop.eup %2392  ;;  %v1662_v52 = vmul.f32 %v1885_v34, %v1649_v62  ;;  %v1638_v29 = vmul.f32 %v1883_v30, %v1625_v4 }
 0x4d1   : > { %v2395_v59 = vpop.eup %2394  ;;  %1674 = vadd.xlane.f32.xlu1 %v1663_v61  ;;  %v1652_v3 = vadd.f32 %v1884_v39, %v1639_v7  ;;  %v1628_v17 = vmul.f32 %v2393_v57, %v3354_v46  ;;  %v1886_v46 = vld [vmem:[%s3406_s1 + $0x1cc] ss:$0 sm:$0xff] }
 0x4d2   : > { %1672 = vadd.xlane.f32.xlu0 %v1662_v52  ;;  %v1651_v44 = vadd.f32 %v1884_v39, %v1638_v29  ;;  %v1627_v14 = vmul.f32 %v2395_v59, %v3356_v41 }
 0x4d3   : > { %v1665_v63 = vmul.f32 %v1885_v34, %v1652_v3  ;;  %v1641_v60 = vmul.f32 %v1883_v30, %v1628_v17 }
 0x4d4   : > { %v1664_v33 = vmul.f32 %v1885_v34, %v1651_v44  ;;  %v1640_v21 = vmul.f32 %v1883_v30, %v1627_v14 }
 0x4d5   : > { %1678 = vadd.xlane.f32.xlu1 %v1665_v63  ;;  %v1654_v35 = vadd.f32 %v1884_v39, %v1641_v60 }
 0x4d6   : > { %1676 = vadd.xlane.f32.xlu0 %v1664_v33  ;;  %v1653_v5 = vadd.f32 %v1884_v39, %v1640_v21 }
 0x4d7   : > { %v1667_v31 = vmul.f32 %v1885_v34, %v1654_v35 }
 0x4d8   : > { %v1666_v58 = vmul.f32 %v1885_v34, %v1653_v5 }
 0x4d9   : > { %1682 = vadd.xlane.f32.xlu1 %v1667_v31 }
 0x4da   : > { %1680 = vadd.xlane.f32.xlu0 %v1666_v58 }
 0x55a   : > { %v1671_v24 = vpop.xlane.xlu1 %1670 }
 0x55b   : > { %v1690_v49 = vadd.f32 %v1886_v46, %v1671_v24  ;;  %v1669_v11 = vpop.xlane.xlu0 %1668 }
 0x55c   : > { %v1689_v41 = vadd.f32 %v1886_v46, %v1669_v11 }
 0x55d   : > { %v1698_v48 = vsub.f32 0.0, %v1690_v49 }
 0x55e   : > { %v1697_v50 = vsub.f32 0.0, %v1689_v41  ;;  %v1675_v10 = vpop.xlane.xlu1 %1674 }
 0x55f   : > { %v1707_v13 = vmul.f32 1.442695, %v1698_v48  ;;  %v1692_v40 = vadd.f32 %v1886_v46, %v1675_v10  ;;  %v1673_v2 = vpop.xlane.xlu0 %1672 }
 0x560   : > { %v1705_v56 = vmul.f32 1.442695, %v1697_v50  ;;  %v1691_v42 = vadd.f32 %v1886_v46, %v1673_v2 }
 0x561   : > { %2396 = vpow2.f32 %v1707_v13  ;;  %v1700_v26 = vsub.f32 0.0, %v1692_v40 }
 0x562   : > { %2398 = vpow2.f32 %v1705_v56  ;;  %v1699_v20 = vsub.f32 0.0, %v1691_v42  ;;  %v1679_v9 = vpop.xlane.xlu1 %1678 }
 0x563   : > { %v1711_v47 = vmul.f32 1.442695, %v1700_v26  ;;  %v1694_v6 = vadd.f32 %v1886_v46, %v1679_v9  ;;  %v1677_v45 = vpop.xlane.xlu0 %1676 }
 0x564   : > { %v1709_v15 = vmul.f32 1.442695, %v1699_v20  ;;  %v1693_v36 = vadd.f32 %v1886_v46, %v1677_v45 }
 0x565   : > { %2400 = vpow2.f32 %v1711_v47  ;;  %v1702_v30 = vsub.f32 0.0, %v1694_v6 }
 0x566   : > { %2402 = vpow2.f32 %v1709_v15  ;;  %v1701_v51 = vsub.f32 0.0, %v1693_v36  ;;  %v1683_v32 = vpop.xlane.xlu1 %1682 }
 0x567   : > { %v1715_v1 = vmul.f32 1.442695, %v1702_v30  ;;  %v1696_v39 = vadd.f32 %v1886_v46, %v1683_v32  ;;  %v1681_v27 = vpop.xlane.xlu0 %1680 }
 0x568   : > { %v1713_v53 = vmul.f32 1.442695, %v1701_v51  ;;  %v1695_v54 = vadd.f32 %v1886_v46, %v1681_v27 }
 0x569   : > { %2404 = vpow2.f32 %v1715_v1  ;;  %v1704_v34 = vsub.f32 0.0, %v1696_v39 }
 0x56a   : > { %2406 = vpow2.f32 %v1713_v53  ;;  %v1703_v38 = vsub.f32 0.0, %v1695_v54 }
 0x56b   : > { %v2397_v18 = vpop.eup %2396  ;;  %v1719_v25 = vmul.f32 1.442695, %v1704_v34 }
 0x56c   : > { %v2399_v55 = vpop.eup %2398  ;;  %v1722_v22 = vadd.f32 1.0, %v2397_v18  ;;  %v1717_v12 = vmul.f32 1.442695, %v1703_v38 }
 0x56d   : > { %v1721_v0 = vadd.f32 1.0, %v2399_v55  ;;  %2408 = vpow2.f32 %v1719_v25 }
 0x56e   : > { %2410 = vrcp.f32 %v1722_v22 }
 0x56f   : > { %v2401_v8 = vpop.eup %2400  ;;  %2412 = vrcp.f32 %v1721_v0 }
 0x570   : > { %v2403_v37 = vpop.eup %2402  ;;  %v1724_v16 = vadd.f32 1.0, %v2401_v8  ;;  %2414 = vpow2.f32 %v1717_v12 }
 0x571   : > { %v1723_v43 = vadd.f32 1.0, %v2403_v37 }
 0x572   : > { %2416 = vrcp.f32 %v1724_v16 }
 0x573   : > { %v2405_v28 = vpop.eup %2404  ;;  %2418 = vrcp.f32 %v1723_v43 }
 0x574   : > { %v2407_v19 = vpop.eup %2406  ;;  %v1726_v23 = vadd.f32 1.0, %v2405_v28 }
 0x575   : > { %v1725_v62 = vadd.f32 1.0, %v2407_v19 }
 0x576   : > { %2420 = vrcp.f32 %v1726_v23 }
 0x577   : > { %v2409_v4 = vpop.eup %2408  ;;  %2422 = vrcp.f32 %v1725_v62 }
 0x578   : > { %v2411_v61 = vpop.eup %2410  ;;  %v1728_v7 = vadd.f32 1.0, %v2409_v4 }
 0x579   : > { %v2413_v57 = vpop.eup %2412  ;;  %1747 = vst.msk [vmem:[%s367_s5 + $0x8] sm:$0xff] %vm1745_vm1, %v2411_v61 }
 0x57a   : > { %v2415_v52 = vpop.eup %2414  ;;  %1746 = vst.msk [vmem:[%s367_s5] sm:$0xff] %vm1745_vm1, %v2413_v57  ;;  %2424 = vrcp.f32 %v1728_v7 }
 0x57b   : > { %v1727_v29 = vadd.f32 1.0, %v2415_v52 }
 0x57c   : > { %v2417_v59 = vpop.eup %2416 }
 0x57d   : > { %v2419_v3 = vpop.eup %2418  ;;  %1749 = vst.msk [vmem:[%s367_s5 + $0x18] sm:$0xff] %vm1745_vm1, %v2417_v59  ;;  %2426 = vrcp.f32 %v1727_v29 }
 0x57e   : > { %1748 = vst.msk [vmem:[%s367_s5 + $0x10] sm:$0xff] %vm1745_vm1, %v2419_v3 }
 0x580   : > { %v2421_v17 = vpop.eup %2420 }
 0x581   : > { %v2423_v44 = vpop.eup %2422  ;;  %1751 = vst.msk [vmem:[%s367_s5 + $0x28] sm:$0xff] %vm1745_vm1, %v2421_v17 }
 0x582   : > { %1750 = vst.msk [vmem:[%s367_s5 + $0x20] sm:$0xff] %vm1745_vm1, %v2423_v44 }
 0x584   : > { %v2425_v14 = vpop.eup %2424 }
 0x585   : > { %1753 = vst.msk [vmem:[%s367_s5 + $0x38] sm:$0xff] %vm1745_vm1, %v2425_v14 }
 0x587   : > { %v2427_v63 = vpop.eup %2426 }
 0x588   : > { %1752 = vst.msk [vmem:[%s367_s5 + $0x30] sm:$0xff] %vm1745_vm1, %v2427_v63 }
 0x589 PF: > { %p9_p9 = scmp.ge.s32.totalorder %s2484_s13, 4   ;;  %s3408_s9 = smov %s2446_s10 }
 0x58a   : > { %s3409_s10 = smov %s2493_s16  ;;  %s3410_s11 = smov %s2484_s13 }
 0x58b   :  { %11 = sbr.rel (!%p9_p9) target bundleno = 2 (0x2), region = 106 }

</bundles_post_ra>
